<compile_context>
chip_gen: v5e
topology: v5e:2x2
jax: 0.10.0
libtpu: 0.0.40
codegen_flags: <defaults>
</compile_context>

<pallas_src>
import math

import jax
import jax.numpy as jnp
from jax.experimental import pallas as pl
from jax.experimental.pallas import tpu as pltpu


# ----------------------------- fused Pallas kernel ------------------------- #

def _liquid_tanh(z):
    # tanh(z) + 0.1*sin(0.5 z)*cos(0.3 z) == tanh(z) + 0.05*(sin(0.8 z) + sin(0.2 z))
    # (product-to-sum: one fewer VPU multiply, same 3 EUP transcendentals/elem).
    # TODO(synk): at large batch this kernel is EUP-bound (3 transcendentals per
    # element); only a polynomial approximation of liquid_tanh moves that roof.
    return jnp.tanh(z) + 0.05 * (jnp.sin(0.8 * z) + jnp.sin(0.2 * z))


def make_fused_kernel(n_layers, compute_dtype):
    """Kernel over refs: (x, W0, B0, W1, B1, ..., W_L, B_L, out).

    Stage 0 = first layer's input projection; stages 1..L-1 are the cross-layer
    folded matmuls; stage L is the folded, lane-padded output head.  Each layer
    body is exactly one lane-dense matmul followed by liquid_tanh -- no narrow
    (TB, num_neurons) intermediate ever materializes.
    Training-time gaussian noise / dropout omitted -> inference only.
    """
    def kernel(*refs):
        x_ref, o_ref = refs[0], refs[-1]
        w0_ref, b0_ref = refs[1], refs[2]
        z = jnp.dot(x_ref[...].astype(compute_dtype),
                    w0_ref[...].astype(compute_dtype),
                    preferred_element_type=jnp.float32) + b0_ref[...]
        for k in range(n_layers):
            a = _liquid_tanh(z)
            w_ref, b_ref = refs[3 + 2 * k], refs[4 + 2 * k]
            z = jnp.dot(a.astype(compute_dtype),
                        w_ref[...].astype(compute_dtype),
                        preferred_element_type=jnp.float32) + b_ref[...]
        o_ref[...] = z                     # (tile_b, O_pad): unmasked full-lane store
    return kernel


def liquid_nn_forward(x, stages, out_features, compute_dtype=jnp.float32):
    """Single-pallas_call fused forward pass.

    stages: list of (W, B) f32 pairs (cross-layer folded); the last stage's
    output width is already padded to a multiple of 128 lanes.
    """
    B, I = x.shape
    O_pad = stages[-1][0].shape[1]
    n_layers = len(stages) - 1

    # Fixed, sublane/MXU-friendly batch tile; pad the remainder with zero rows
    # (rows are independent, padded rows are sliced away below).
    tile_b = 256 if B >= 256 else max(8, ((B + 7) // 8) * 8)
    B_pad = ((B + tile_b - 1) // tile_b) * tile_b
    if B_pad != B:
        x = jnp.pad(x, ((0, B_pad - B), (0, 0)))
    grid = (B_pad // tile_b,)

    def replicated_spec(arr):
        # Grid-invariant resident weight: same (0, ...) block every step.
        # TODO(synk): at scale mark these single-buffered (pipeline_mode) and
        # store in bf16 to halve resident VMEM under v7x's 64 MiB ceiling.
        return pl.BlockSpec(arr.shape, lambda i: (0,) * arr.ndim)

    flat_args = [x]
    in_specs = [pl.BlockSpec((tile_b, I), lambda i: (i, 0))]
    flops = 0
    transcendentals = 0
    bytes_accessed = int(x.size) * 4 + B_pad * O_pad * 4
    for si, (w, b) in enumerate(stages):
        flat_args += [w, b]
        in_specs += [replicated_spec(w), replicated_spec(b)]
        k_dim, n_dim = w.shape
        flops += 2 * B_pad * k_dim * n_dim
        if si < n_layers:                       # liquid_tanh follows this stage
            transcendentals += 3 * B_pad * n_dim
        bytes_accessed += int(w.size + b.size) * 4

    out = pl.pallas_call(
        make_fused_kernel(n_layers, compute_dtype),
        out_shape=jax.ShapeDtypeStruct((B_pad, O_pad), jnp.float32),
        grid=grid,
        in_specs=in_specs,
        out_specs=pl.BlockSpec((tile_b, O_pad), lambda i: (i, 0)),
        compiler_params=pltpu.CompilerParams(
            dimension_semantics=("parallel",),
            vmem_limit_bytes=32 * 1024 * 1024),
        cost_estimate=pl.CostEstimate(flops=flops,
                                      transcendentals=transcendentals,
                                      bytes_accessed=bytes_accessed),
    )(*flat_args)
    return out[:B, :out_features]


# ------------------------- deterministic parameters ------------------------ #

def _linear_init(key, fan_in, fan_out):
    """nn.Linear-style init: U(-1/sqrt(fan_in), 1/sqrt(fan_in))."""
    k1, k2 = jax.random.split(key)
    bound = 1.0 / math.sqrt(fan_in)
    w = jax.random.uniform(k1, (fan_out, fan_in), jnp.float32, -bound, bound)
    b = jax.random.uniform(k2, (fan_out,), jnp.float32, -bound, bound)
    return w, b


def init_liquid_layer(key, input_size, num_neurons, liquid_state_size,
                      lateral_connectivity=0.3):
    N, L = num_neurons, liquid_state_size
    keys = jax.random.split(key, N + 2)

    w_in_cols, b_comb, b_out_list = [], [], []
    w_out_block = jnp.zeros((N * L, N), jnp.float32)
    for n in range(N):
        kn = jax.random.split(keys[n], 3)
        W_in, b_in = _linear_init(kn[0], input_size, L)   # input_projection
        _W_ls, b_ls = _linear_init(kn[1], L, L)           # liquid_state (weight unused: h0 == 0)
        W_o, b_o = _linear_init(kn[2], L, 1)              # output_projection
        w_in_cols.append(W_in.T)                          # (I, L)
        b_comb.append(b_in + b_ls)
        w_out_block = w_out_block.at[n * L:(n + 1) * L, n].set(W_o[0])
        b_out_list.append(b_o[0])

    w_in = jnp.concatenate(w_in_cols, axis=1)             # (I, N*L)
    b_in_comb = jnp.concatenate(b_comb)[None, :]          # (1, N*L)
    b_out = jnp.stack(b_out_list)[None, :]                # (1, N)

    # lateral_weights = randn * 0.1 with sparse off-diagonal mask
    w_lat = jax.random.normal(keys[N], (N, N), jnp.float32) * 0.1
    mask = jax.random.uniform(keys[N + 1], (N, N)) < lateral_connectivity
    mask = mask & (~jnp.eye(N, dtype=bool))
    w_lat = w_lat * mask.astype(jnp.float32)

    adapt = jnp.ones((1, N), jnp.float32)                 # adaptation_state

    # Fold lateral connections + adaptation scaling into the output matmul:
    #   out = ((a @ w_out + b_out) @ (I + 0.1*W_lat)) * adapt = a @ w_post + b_post
    hp = jax.lax.Precision.HIGHEST
    post = (jnp.eye(N, dtype=jnp.float32) + 0.1 * w_lat) * adapt   # column-scaled
    w_post = jnp.dot(w_out_block, post, precision=hp)              # (N*L, N)
    b_post = jnp.dot(b_out, post, precision=hp)                    # (1, N)

    return dict(w_in=w_in, b_in=b_in_comb,
                w_post=w_post, b_post=b_post,
                # unfolded params kept only for the pure-JAX reference check
                w_out=w_out_block, b_out=b_out, w_lat=w_lat, adapt=adapt)


def init_network(key, input_size, hidden_sizes, output_size, liquid_state_size):
    keys = jax.random.split(key, len(hidden_sizes) + 1)
    layers = []
    in_sz = input_size
    for i, h in enumerate(hidden_sizes):
        layers.append(init_liquid_layer(keys[i], in_sz, h, liquid_state_size))
        in_sz = h
    W_out, b_out = _linear_init(keys[-1], in_sz, output_size)
    return layers, (W_out.T, b_out[None, :])


def fold_network(layers, out_params):
    """Cross-layer fold -> list of (W, B) stages, head padded to 128 lanes.

      stage 0:  W = w_in_0,                    B = b_in_0
      stage k:  W = w_post_{k-1} @ w_in_k,     B = b_post_{k-1} @ w_in_k + b_in_k
      head:     W = w_post_last @ W_final_pad, B = b_post_last @ W_final_pad + b_final_pad
    """
    hp = jax.lax.Precision.HIGHEST
    stages = [(layers[0]["w_in"], layers[0]["b_in"])]
    for k in range(1, len(layers)):
        W = jnp.dot(layers[k - 1]["w_post"], layers[k]["w_in"], precision=hp)
        Bv = jnp.dot(layers[k - 1]["b_post"], layers[k]["w_in"],
                     precision=hp) + layers[k]["b_in"]
        stages.append((W, Bv))
    w_f, b_f = out_params                                   # (N_last, O), (1, O)
    O = w_f.shape[1]
    O_pad = ((O + 127) // 128) * 128
    w_f_p = jnp.pad(w_f, ((0, 0), (0, O_pad - O)))          # zero lanes -> sliced off later
    b_f_p = jnp.pad(b_f, ((0, 0), (0, O_pad - O)))
    W = jnp.dot(layers[-1]["w_post"], w_f_p, precision=hp)
    Bv = jnp.dot(layers[-1]["b_post"], w_f_p, precision=hp) + b_f_p
    stages.append((W, Bv))
    return stages


# ------------------------------- reference --------------------------------- #

def reference_forward(x, layers, out_params):
    """Pure-JAX reference using the UNFOLDED math (validates all init-time folds)."""
    for p in layers:
        z = x @ p["w_in"] + p["b_in"]
        a = jnp.tanh(z) + 0.1 * jnp.sin(0.5 * z) * jnp.cos(0.3 * z)
        y = a @ p["w_out"] + p["b_out"]
        y = y + 0.1 * (y @ p["w_lat"])
        x = y * p["adapt"]
    w, b = out_params
    return x @ w + b


# ----------------------------------- main ----------------------------------- #

if __name__ == "__main__":
    key = jax.random.PRNGKey(0)
    k_x, k_p = jax.random.split(key)

    batch = 2
    input_size = 16
    hidden_sizes = [8, 8]
    output_size = 12
    liquid_state_size = 32

    x = jax.random.normal(k_x, (batch, input_size), jnp.float32)
    layers, out_params = init_network(k_p, input_size, hidden_sizes,
                                      output_size, liquid_state_size)
    stages = fold_network(layers, out_params)

    out = liquid_nn_forward(x, stages, output_size)
    out = jax.block_until_ready(out)

    ref = reference_forward(x, layers, out_params)
    assert out.shape == (batch, output_size), out.shape
    err = float(jnp.max(jnp.abs(out - ref)))
    assert jnp.allclose(out, ref, atol=1e-4, rtol=1e-4), f"max abs err {err}"

    print("KERNEL_OK")
</pallas_src>

<mosaic_0001>
module attributes {stable_mosaic.version = 11 : i64} {
  func.func @kernel(%arg0: i32, %arg1: memref<8x16xf32, #tpu.memory_space<vmem>>, %arg2: memref<16x256xf32, #tpu.memory_space<vmem>>, %arg3: memref<1x256xf32, #tpu.memory_space<vmem>>, %arg4: memref<256x256xf32, #tpu.memory_space<vmem>>, %arg5: memref<1x256xf32, #tpu.memory_space<vmem>>, %arg6: memref<256x128xf32, #tpu.memory_space<vmem>>, %arg7: memref<1x128xf32, #tpu.memory_space<vmem>>, %arg8: memref<8x128xf32, #tpu.memory_space<vmem>>) attributes {dimension_semantics = [#tpu.dimension_semantics<parallel>], iteration_bounds = array<i64: 1>, scalar_prefetch = 0 : i64, scratch_operands = 0 : i64, tpu.core_type = #tpu.core_type<tc>, window_params = [{transform_indices = @transform_0, window_bounds = array<i64: 8, 16>}, {pipeline_mode = #tpu.pipeline_mode<synchronous>, transform_indices = @transform_1, window_bounds = array<i64: 16, 256>}, {pipeline_mode = #tpu.pipeline_mode<synchronous>, transform_indices = @transform_2, window_bounds = array<i64: 1, 256>}, {pipeline_mode = #tpu.pipeline_mode<synchronous>, transform_indices = @transform_3, window_bounds = array<i64: 256, 256>}, {pipeline_mode = #tpu.pipeline_mode<synchronous>, transform_indices = @transform_4, window_bounds = array<i64: 1, 256>}, {pipeline_mode = #tpu.pipeline_mode<synchronous>, transform_indices = @transform_5, window_bounds = array<i64: 256, 128>}, {pipeline_mode = #tpu.pipeline_mode<synchronous>, transform_indices = @transform_6, window_bounds = array<i64: 1, 128>}, {transform_indices = @transform_7, window_bounds = array<i64: 8, 128>}]} {
    %c0 = arith.constant 0 : index
    %c0_0 = arith.constant 0 : index
    %0 = vector.load %arg1[%c0, %c0_0] : memref<8x16xf32, #tpu.memory_space<vmem>>, vector<8x16xf32>
    %c0_1 = arith.constant 0 : index
    %c0_2 = arith.constant 0 : index
    %1 = vector.load %arg2[%c0_1, %c0_2] : memref<16x256xf32, #tpu.memory_space<vmem>>, vector<16x256xf32>
    %cst = arith.constant dense<0.000000e+00> : vector<8x256xf32>
    %2 = tpu.matmul %0, %1, %cst {dimension_numbers = #tpu.dot_dimension_numbers<[1], [0], [0], [1], [0, 0, 1, 1], [], []>} : vector<8x16xf32>, vector<16x256xf32>, vector<8x256xf32> -> vector<8x256xf32>
    %c0_3 = arith.constant 0 : index
    %c0_4 = arith.constant 0 : index
    %3 = vector.load %arg3[%c0_3, %c0_4] : memref<1x256xf32, #tpu.memory_space<vmem>>, vector<1x256xf32>
    %4 = vector.broadcast %3 : vector<1x256xf32> to vector<8x256xf32>
    %5 = arith.addf %2, %4 : vector<8x256xf32>
    %6 = math.tanh %5 : vector<8x256xf32>
    %cst_5 = arith.constant 8.000000e-01 : f32
    %7 = vector.broadcast %cst_5 : f32 to vector<8x256xf32>
    %8 = arith.mulf %7, %5 : vector<8x256xf32>
    %9 = math.sin %8 : vector<8x256xf32>
    %cst_6 = arith.constant 2.000000e-01 : f32
    %10 = vector.broadcast %cst_6 : f32 to vector<8x256xf32>
    %11 = arith.mulf %10, %5 : vector<8x256xf32>
    %12 = math.sin %11 : vector<8x256xf32>
    %13 = arith.addf %9, %12 : vector<8x256xf32>
    %cst_7 = arith.constant 5.000000e-02 : f32
    %14 = vector.broadcast %cst_7 : f32 to vector<8x256xf32>
    %15 = arith.mulf %14, %13 : vector<8x256xf32>
    %16 = arith.addf %6, %15 : vector<8x256xf32>
    %c0_8 = arith.constant 0 : index
    %c0_9 = arith.constant 0 : index
    %17 = vector.load %arg4[%c0_8, %c0_9] : memref<256x256xf32, #tpu.memory_space<vmem>>, vector<256x256xf32>
    %cst_10 = arith.constant dense<0.000000e+00> : vector<8x256xf32>
    %18 = tpu.matmul %16, %17, %cst_10 {dimension_numbers = #tpu.dot_dimension_numbers<[1], [0], [0], [1], [0, 0, 1, 1], [], []>} : vector<8x256xf32>, vector<256x256xf32>, vector<8x256xf32> -> vector<8x256xf32>
    %c0_11 = arith.constant 0 : index
    %c0_12 = arith.constant 0 : index
    %19 = vector.load %arg5[%c0_11, %c0_12] : memref<1x256xf32, #tpu.memory_space<vmem>>, vector<1x256xf32>
    %20 = vector.broadcast %19 : vector<1x256xf32> to vector<8x256xf32>
    %21 = arith.addf %18, %20 : vector<8x256xf32>
    %22 = math.tanh %21 : vector<8x256xf32>
    %cst_13 = arith.constant 8.000000e-01 : f32
    %23 = vector.broadcast %cst_13 : f32 to vector<8x256xf32>
    %24 = arith.mulf %23, %21 : vector<8x256xf32>
    %25 = math.sin %24 : vector<8x256xf32>
    %cst_14 = arith.constant 2.000000e-01 : f32
    %26 = vector.broadcast %cst_14 : f32 to vector<8x256xf32>
    %27 = arith.mulf %26, %21 : vector<8x256xf32>
    %28 = math.sin %27 : vector<8x256xf32>
    %29 = arith.addf %25, %28 : vector<8x256xf32>
    %cst_15 = arith.constant 5.000000e-02 : f32
    %30 = vector.broadcast %cst_15 : f32 to vector<8x256xf32>
    %31 = arith.mulf %30, %29 : vector<8x256xf32>
    %32 = arith.addf %22, %31 : vector<8x256xf32>
    %c0_16 = arith.constant 0 : index
    %c0_17 = arith.constant 0 : index
    %33 = vector.load %arg6[%c0_16, %c0_17] : memref<256x128xf32, #tpu.memory_space<vmem>>, vector<256x128xf32>
    %cst_18 = arith.constant dense<0.000000e+00> : vector<8x128xf32>
    %34 = tpu.matmul %32, %33, %cst_18 {dimension_numbers = #tpu.dot_dimension_numbers<[1], [0], [0], [1], [0, 0, 1, 1], [], []>} : vector<8x256xf32>, vector<256x128xf32>, vector<8x128xf32> -> vector<8x128xf32>
    %c0_19 = arith.constant 0 : index
    %c0_20 = arith.constant 0 : index
    %35 = vector.load %arg7[%c0_19, %c0_20] : memref<1x128xf32, #tpu.memory_space<vmem>>, vector<1x128xf32>
    %36 = vector.broadcast %35 : vector<1x128xf32> to vector<8x128xf32>
    %37 = arith.addf %34, %36 : vector<8x128xf32>
    %c0_21 = arith.constant 0 : index
    %c0_22 = arith.constant 0 : index
    %38 = vector.load %arg8[%c0_21, %c0_22] : memref<8x128xf32, #tpu.memory_space<vmem>>, vector<8x128xf32>
    tpu.vector_store %arg8[%c0_21, %c0_22], %37 {strides = array<i32>} : memref<8x128xf32, #tpu.memory_space<vmem>>, vector<8x128xf32>,
    return
  }
  func.func @transform_0(%arg0: i32) -> (i32, i32) {
    %c0_i32 = arith.constant 0 : i32
    %c0_i32_0 = arith.constant 0 : i32
    return %arg0, %c0_i32 : i32, i32
  }
  func.func @transform_1(%arg0: i32) -> (i32, i32) {
    %c0_i32 = arith.constant 0 : i32
    %c0_i32_0 = arith.constant 0 : i32
    %c0_i32_1 = arith.constant 0 : i32
    return %c0_i32, %c0_i32_0 : i32, i32
  }
  func.func @transform_2(%arg0: i32) -> (i32, i32) {
    %c0_i32 = arith.constant 0 : i32
    %c0_i32_0 = arith.constant 0 : i32
    %c0_i32_1 = arith.constant 0 : i32
    return %c0_i32, %c0_i32_0 : i32, i32
  }
  func.func @transform_3(%arg0: i32) -> (i32, i32) {
    %c0_i32 = arith.constant 0 : i32
    %c0_i32_0 = arith.constant 0 : i32
    %c0_i32_1 = arith.constant 0 : i32
    return %c0_i32, %c0_i32_0 : i32, i32
  }
  func.func @transform_4(%arg0: i32) -> (i32, i32) {
    %c0_i32 = arith.constant 0 : i32
    %c0_i32_0 = arith.constant 0 : i32
    %c0_i32_1 = arith.constant 0 : i32
    return %c0_i32, %c0_i32_0 : i32, i32
  }
  func.func @transform_5(%arg0: i32) -> (i32, i32) {
    %c0_i32 = arith.constant 0 : i32
    %c0_i32_0 = arith.constant 0 : i32
    %c0_i32_1 = arith.constant 0 : i32
    return %c0_i32, %c0_i32_0 : i32, i32
  }
  func.func @transform_6(%arg0: i32) -> (i32, i32) {
    %c0_i32 = arith.constant 0 : i32
    %c0_i32_0 = arith.constant 0 : i32
    %c0_i32_1 = arith.constant 0 : i32
    return %c0_i32, %c0_i32_0 : i32, i32
  }
  func.func @transform_7(%arg0: i32) -> (i32, i32) {
    %c0_i32 = arith.constant 0 : i32
    %c0_i32_0 = arith.constant 0 : i32
    return %arg0, %c0_i32 : i32, i32
  }
}

</mosaic_0001>

<bundles_post_ra>
// kernel: tpu_custom_call.1
= control target key start
LH: loop header
LB: loop body
LE: loop exit
PB: predicated region body
PF: predicated region fallthrough
CT: control target
= control target key end

     0   :  { %12 = vsyncpa [#allocation3], 0  ;;  %s3086_s0 = inlined_call_operand.hbm [shape: f32[8,16], index: 0, kind: input, shape index: {}]   ;;  %s3087_s1 = inlined_call_operand.hbm [shape: f32[16,256], index: 1, kind: input, shape index: {}]   ;;  %s3088_s2 = inlined_call_operand.hbm [shape: f32[1,256], index: 2, kind: input, shape index: {}]   ;;  %s3089_s3 = inlined_call_operand.hbm [shape: f32[256,256], index: 3, kind: input, shape index: {}]   ;;  %s3090_s4 = inlined_call_operand.vmem [shape: f32[1,256], index: 4, kind: input, shape index: {}]   ;;  %s3091_s5 = inlined_call_operand.hbm [shape: f32[256,128], index: 5, kind: input, shape index: {}]   ;;  %s3092_s6 = inlined_call_operand.vmem [shape: f32[1,128], index: 6, kind: input, shape index: {}]   ;;  %s3093_s7 = inlined_call_operand.hbm [shape: f32[8,128], index: 7, kind: output, shape index: {}]  }
   0x1   :  { %13 = vsyncpa [#allocation6], 0 }
   0x2   :  { %14 = vsyncpa [#allocation9], 0  ;;  %s31_s26 = sshll.u32 %s3087_s1, 4  ;;  %s32_s26 = int_to_ptr.hbm [resolvable:$true] %s31_s26 }
   0x3   :  { %15 = vsyncpa [#allocation4], 0  ;;  %s1870_s27 = smov [#allocation5]   ;;  %s55_s8 = sshll.u32 %s3089_s3, 4  ;;  %s56_s8 = int_to_ptr.hbm [resolvable:$true] %s55_s8 }
   0x4   :  { %s33_s28 = sshll.u32 %s1870_s27, 4  ;;  %s1871_s9 = smov 256   ;;  %s34_s28 = int_to_ptr.vmem [resolvable:$true] %s33_s28 }
   0x5   :  { %s1872_s10 = smov 16   ;;  %s1873_s11 = smov [#allocation8]  }
   0x6   :  { %39 = dma.hbm_to_vmem [thread:$0]  %s32_s26, 512, %s34_s28, [#allocation6], %s1871_s9, %s1871_s9, %s1872_s10  }
   0x7   :  { %s57_s12 = sshll.u32 %s1873_s11, 4  ;;  %s21_s15 = sshll.u32 %s3086_s0, 4  ;;  %s58_s12 = int_to_ptr.vmem [resolvable:$true] %s57_s12  ;;  %s22_s15 = int_to_ptr.hbm [resolvable:$true] %s21_s15 }
   0x8   :  { %63 = dma.hbm_to_vmem [thread:$0]  %s56_s8, 8192, %s58_s12, [#allocation9], %s1871_s9, %s1871_s9, %s1872_s10  }
   0x9   :  { %s45_s17 = sshll.u32 %s3088_s2, 4  ;;  %s1874_s18 = smov [#allocation2]   ;;  %s46_s17 = int_to_ptr.hbm [resolvable:$true] %s45_s17 }
   0xa   :  { %s23_s19 = sshll.u32 %s1874_s18, 4  ;;  %s1875_s3 = smov [#allocation7]   ;;  %s24_s19 = int_to_ptr.vmem [resolvable:$true] %s23_s19 }
   0xb   :  { %26 = dma.hbm_to_vmem [thread:$0]  %s22_s15, 128, %s24_s19, [#allocation3]  }
   0xc   :  { %s47_s20 = sshll.u32 %s1875_s3, 4  ;;  %s70_s23 = sshll.u32 %s3091_s5, 4  ;;  %s48_s20 = int_to_ptr.vmem [resolvable:$true] %s47_s20  ;;  %s71_s23 = int_to_ptr.hbm [resolvable:$true] %s70_s23 }
   0xd   :  { %50 = dma.hbm_to_vmem [thread:$0]  %s46_s17, 32, %s48_s20, [#allocation6]  }
   0xe   :  { %s1876_s0 = smov [#allocation10]   ;;  %s1877_s25 = smov 128  }
   0xf   :  { %s72_s24 = sshll.u32 %s1876_s0, 4  ;;  %s1878_s26 = smov 8   ;;  %s73_s24 = int_to_ptr.vmem [resolvable:$true] %s72_s24 }
  0x10   :  { %78 = dma.hbm_to_vmem [thread:$0]  %s71_s23, 4096, %s73_s24, [#allocation9], %s1877_s25, %s1877_s25, %s1878_s26  }
  0x11   :  { %1862 = dma.done.wait [#allocation3], 128  }
  0x12   :  { %1863 = vsyncadd [#allocation3], 4294967168 }
  0x13   :  { %1864 = dma.done.wait [#allocation6], 544  }
  0x14   :  { %1865 = vsyncadd [#allocation6], 4294966752 }
  0x15   :  { %1866 = dma.done.wait [#allocation9], 12288  }
  0x16   :  { %1867 = vsyncadd [#allocation9], 4294955008  ;;  %v104_v0 = vld [vmem:[#allocation5 + $0x10] sm:$0xff]  ;;  %v105_v1 = vld [vmem:[#allocation5 + $0x18] sm:$0xff]  ;;  %vm112_vm0 = vcmask 130048   ;;  %s1886_s28 = smov [#allocation11]  }
  0x17   :  { %v102_v2 = vld [vmem:[#allocation5] sm:$0xff]  ;;  %130 = vmatpush.msra.mxu0 %v104_v0  ;;  %150 = vmatpush.msra.mxu1 %v105_v1  ;;  %v103_v3 = vld [vmem:[#allocation5 + $0x8] sm:$0xff]  ;;  %v101_v4 = vld [vmem:[#allocation2] sm:$0xff]  ;;  %s1652_s29 = sshll.u32 %s1886_s28, 4  ;;  %s1654_s9 = sshll.u32 %s3093_s7, 4  ;;  %s1653_s29 = int_to_ptr.vmem [resolvable:$true] %s1652_s29  ;;  %s1655_s9 = int_to_ptr.hbm [resolvable:$true] %s1654_s9 }
  0x18   :  { %v106_v5 = vld [vmem:[#allocation7] sm:$0x3]  ;;  %v818_v8 = vld [vmem:[#allocation8 + $0xf0] sm:$0xff]  ;;  %v816_v12 = vld [vmem:[#allocation8 + $0xe0] sm:$0xff] }
  0x19   :  { %131 = vmatpush.msra.mxu0 %v102_v2  ;;  %151 = vmatpush.msra.mxu1 %v103_v3  ;;  %v108_v6 = vperm.slane %v106_v5, 0  ;;  %v109_v7 = vperm.slane %v106_v5, 1  ;;  %v850_v9 = vld [vmem:[#allocation8 + $0x1f0] sm:$0xff]  ;;  %v819_v10 = vld [vmem:[#allocation8 + $0xf8] sm:$0xff]  ;;  %v848_v13 = vld [vmem:[#allocation8 + $0x1e0] sm:$0xff] }
  0x1a   :  { %1666 = vmatmul.msk.f32.vlgmr.msra.gmra.mxu0 %vm112_vm0, %v101_v4  ;;  %1667 = vmatmul.msk.f32.vlgmr.msra.gmra.mxu1 %vm112_vm0, %v101_v4  ;;  %v851_v11 = vld [vmem:[#allocation8 + $0x1f8] sm:$0xff]  ;;  %v817_v16 = vld [vmem:[#allocation8 + $0xe8] sm:$0xff]  ;;  %v814_v18 = vld [vmem:[#allocation8 + $0xd0] sm:$0xff] }
  0x1b   :  { %858 = vmatpush.msra.mxu2 %v818_v8  ;;  %878 = vmatpush.msra.mxu3 %v850_v9  ;;  %v849_v17 = vld [vmem:[#allocation8 + $0x1e8] sm:$0xff]  ;;  %v846_v21 = vld [vmem:[#allocation8 + $0x1d0] sm:$0xff]  ;;  %v815_v22 = vld [vmem:[#allocation8 + $0xd8] sm:$0xff] }
  0x1c   :  { %898 = vmatpush.msrb.mxu0 %v819_v10  ;;  %918 = vmatpush.msrb.mxu1 %v851_v11  ;;  %v847_v23 = vld [vmem:[#allocation8 + $0x1d8] sm:$0xff]  ;;  %v812_v24 = vld [vmem:[#allocation8 + $0xc0] sm:$0xff]  ;;  %v813_v26 = vld [vmem:[#allocation8 + $0xc8] sm:$0xff] }
  0x1d   :  { %859 = vmatpush.msra.mxu2 %v816_v12  ;;  %879 = vmatpush.msra.mxu3 %v848_v13  ;;  %v844_v25 = vld [vmem:[#allocation8 + $0x1c0] sm:$0xff]  ;;  %v845_v31 = vld [vmem:[#allocation8 + $0x1c8] sm:$0xff]  ;;  %v810_v32 = vld [vmem:[#allocation8 + $0xb0] sm:$0xff] }
  0x1e   :  { %899 = vmatpush.msrb.mxu0 %v817_v16  ;;  %919 = vmatpush.msrb.mxu1 %v849_v17  ;;  %v842_v33 = vld [vmem:[#allocation8 + $0x1b0] sm:$0xff]  ;;  %v811_v37 = vld [vmem:[#allocation8 + $0xb8] sm:$0xff]  ;;  %v808_v40 = vld [vmem:[#allocation8 + $0xa0] sm:$0xff] }
  0x1f   :  { %860 = vmatpush.msra.mxu2 %v814_v18  ;;  %880 = vmatpush.msra.mxu3 %v846_v21  ;;  %v843_v38 = vld [vmem:[#allocation8 + $0x1b8] sm:$0xff]  ;;  %v840_v41 = vld [vmem:[#allocation8 + $0x1a0] sm:$0xff]  ;;  %v809_v45 = vld [vmem:[#allocation8 + $0xa8] sm:$0xff] }
  0x20   :  { %900 = vmatpush.msrb.mxu0 %v815_v22  ;;  %920 = vmatpush.msrb.mxu1 %v847_v23  ;;  %v841_v46 = vld [vmem:[#allocation8 + $0x1a8] sm:$0xff]  ;;  %v806_v47 = vld [vmem:[#allocation8 + $0x90] sm:$0xff]  ;;  %v807_v53 = vld [vmem:[#allocation8 + $0x98] sm:$0xff] }
  0x21   :  { %861 = vmatpush.msra.mxu2 %v812_v24  ;;  %881 = vmatpush.msra.mxu3 %v844_v25  ;;  %v838_v48 = vld [vmem:[#allocation8 + $0x190] sm:$0xff]  ;;  %v839_v54 = vld [vmem:[#allocation8 + $0x198] sm:$0xff]  ;;  %v804_v55 = vld [vmem:[#allocation8 + $0x80] sm:$0xff]  ;;  %v3097_v24 = vmov 1326507024  }
  0x22   :  { %901 = vmatpush.msrb.mxu0 %v813_v26  ;;  %921 = vmatpush.msrb.mxu1 %v845_v31  ;;  %v836_v56 = vld [vmem:[#allocation8 + $0x180] sm:$0xff]  ;;  %v805_v59 = vld [vmem:[#allocation8 + $0x88] sm:$0xff]  ;;  %v802_v62 = vld [vmem:[#allocation8 + $0x70] sm:$0xff] }
  0x23   :  { %862 = vmatpush.msra.mxu2 %v810_v32  ;;  %882 = vmatpush.msra.mxu3 %v842_v33  ;;  %v837_v60 = vld [vmem:[#allocation8 + $0x188] sm:$0xff]  ;;  %v834_v63 = vld [vmem:[#allocation8 + $0x170] sm:$0xff]  ;;  %v803_v1 = vld [vmem:[#allocation8 + $0x78] sm:$0xff] }
  0x24   :  { %902 = vmatpush.msrb.mxu0 %v811_v37  ;;  %922 = vmatpush.msrb.mxu1 %v843_v38  ;;  %v835_v2 = vld [vmem:[#allocation8 + $0x178] sm:$0xff]  ;;  %v800_v5 = vld [vmem:[#allocation8 + $0x60] sm:$0xff]  ;;  %v801_v8 = vld [vmem:[#allocation8 + $0x68] sm:$0xff] }
  0x25   :  { %863 = vmatpush.msra.mxu2 %v808_v40  ;;  %883 = vmatpush.msra.mxu3 %v840_v41  ;;  %v833_v9 = vld [vmem:[#allocation8 + $0x168] sm:$0xff]  ;;  %v798_v11 = vld [vmem:[#allocation8 + $0x50] sm:$0xff]  ;;  %v831_v16 = vld [vmem:[#allocation8 + $0x158] sm:$0xff] }
  0x26   :  { %903 = vmatpush.msrb.mxu0 %v809_v45  ;;  %923 = vmatpush.msrb.mxu1 %v841_v46  ;;  %v830_v12 = vld [vmem:[#allocation8 + $0x150] sm:$0xff]  ;;  %v796_v17 = vld [vmem:[#allocation8 + $0x40] sm:$0xff]  ;;  %v797_v22 = vld [vmem:[#allocation8 + $0x48] sm:$0xff]  ;;  %v3100_v46 = vmov 2102212464  }
  0x27   :  { %864 = vmatpush.msra.mxu2 %v806_v47  ;;  %884 = vmatpush.msra.mxu3 %v838_v48  ;;  %v828_v21 = vld [vmem:[#allocation8 + $0x140] sm:$0xff]  ;;  %v829_v31 = vld [vmem:[#allocation8 + $0x148] sm:$0xff]  ;;  %v794_v32 = vld [vmem:[#allocation8 + $0x30] sm:$0xff] }
  0x28   :  { %904 = vmatpush.msrb.mxu0 %v807_v53  ;;  %924 = vmatpush.msrb.mxu1 %v839_v54  ;;  %v826_v33 = vld [vmem:[#allocation8 + $0x130] sm:$0xff]  ;;  %v827_v40 = vld [vmem:[#allocation8 + $0x138] sm:$0xff]  ;;  %v792_v41 = vld [vmem:[#allocation8 + $0x20] sm:$0xff] }
  0x29   :  { %865 = vmatpush.msra.mxu2 %v804_v55  ;;  %885 = vmatpush.msra.mxu3 %v836_v56  ;;  %v822_v54 = vld [vmem:[#allocation8 + $0x110] sm:$0xff]  ;;  %v791_v55 = vld [vmem:[#allocation8 + $0x18] sm:$0xff] }
  0x2a   :  { %905 = vmatpush.msrb.mxu0 %v805_v59  ;;  %925 = vmatpush.msrb.mxu1 %v837_v60  ;;  %v823_v59 = vld [vmem:[#allocation8 + $0x118] sm:$0xff]  ;;  %v788_v60 = vld [vmem:[#allocation8] sm:$0xff] }
  0x2b   :  { %866 = vmatpush.msra.mxu2 %v802_v62  ;;  %886 = vmatpush.msra.mxu3 %v834_v63  ;;  %v820_v62 = vld [vmem:[#allocation8 + $0x100] sm:$0xff]  ;;  %v789_v63 = vld [vmem:[#allocation8 + $0x8] sm:$0xff] }
  0x2c   :  { %906 = vmatpush.msrb.mxu0 %v803_v1  ;;  %926 = vmatpush.msrb.mxu1 %v835_v2  ;;  %v3103_v1 = vmov 683565275  }
  0x2d   :  { %867 = vmatpush.msra.mxu2 %v800_v5 }
  0x2e   :  { %907 = vmatpush.msrb.mxu0 %v801_v8  ;;  %927 = vmatpush.msrb.mxu1 %v833_v9  ;;  %v821_v8 = vld [vmem:[#allocation8 + $0x108] sm:$0xff] }
  0x2f   :  { %868 = vmatpush.msra.mxu2 %v798_v11  ;;  %v1884_v11 = vmov 2131351028  }
  0x30   :  { %928 = vmatpush.msrb.mxu1 %v831_v16 }
  0x31   :  { %869 = vmatpush.msra.mxu2 %v796_v17 }
  0x32   :  { %929 = vmatpush.msrb.mxu1 %v829_v31 }
  0x33   :  { %870 = vmatpush.msra.mxu2 %v794_v32 }
  0x34   :  { %930 = vmatpush.msrb.mxu1 %v827_v40 }
  0x35   :  { %871 = vmatpush.msra.mxu2 %v792_v41 }
  0x97   :  { %v133_v14 = vpop.f32.mrf.mxu0  ;;  %v153_v15 = vpop.f32.mrf.mxu1 }
  0x98   :  { %v1942_v19 = vadd.f32 %v133_v14, %v108_v6  ;;  %v1944_v20 = vadd.f32 %v153_v15, %v109_v7  ;;  %v832_v6 = vld [vmem:[#allocation8 + $0x160] sm:$0xff]  ;;  %v799_v15 = vld [vmem:[#allocation8 + $0x58] sm:$0xff] }
  0x99   :  { %887 = vmatpush.msra.mxu3 %v832_v6  ;;  %908 = vmatpush.msrb.mxu0 %v799_v15 }
  0x9a   :  { %v1947_v27 = vmul.f32 0.8, %v1942_v19  ;;  %v1950_v28 = vmul.f32 0.2, %v1942_v19  ;;  %v1953_v29 = vmul.f32 0.8, %v1944_v20  ;;  %1710 = vtanh.f32 %v1942_v19 }
  0x9b   :  { %v1956_v30 = vmul.f32 0.2, %v1944_v20  ;;  %888 = vmatpush.msra.mxu3 %v830_v12  ;;  %909 = vmatpush.msrb.mxu0 %v797_v22  ;;  %1712 = vtanh.f32 %v1944_v20  ;;  %v852_v20 = vld [vmem:[%s3090_s4] sm:$0x3] }
  0x9c   :  { %v163_v34 = vand.u32 2139095040, %v1947_v27  ;;  %v475_v35 = vand.u32 2139095040, %v1950_v28  ;;  %v318_v36 = vand.u32 2139095040, %v1953_v29  ;;  %v160_v23 = vand.u32 2147483647, %v1947_v27 }
  0x9d   :  { %v630_v39 = vand.u32 2139095040, %v1956_v30  ;;  %889 = vmatpush.msra.mxu3 %v828_v21  ;;  %v472_v41 = vand.u32 2147483647, %v1950_v28 }
  0x9e   :  { %v164_v42 = vshrl.u32 %v163_v34, 23  ;;  %v476_v43 = vshrl.u32 %v475_v35, 23  ;;  %v319_v44 = vshrl.u32 %v318_v36, 23  ;;  %v795_v34 = vld [vmem:[#allocation8 + $0x38] sm:$0xff]  ;;  %v3098_v36 = vmov 920167782  }
  0x9f   :  { %v631_v52 = vshrl.u32 %v630_v39, 23  ;;  %v167_v45 = vand.u32 8388607, %v160_v23  ;;  %890 = vmatpush.msra.mxu3 %v826_v33  ;;  %910 = vmatpush.msrb.mxu0 %v795_v34 }
  0xa0   :  { %v1668_v49 = vadd.s32 4294967169, %v164_v42  ;;  %v1674_v50 = vadd.s32 4294967169, %v476_v43  ;;  %v1671_v51 = vadd.s32 4294967169, %v319_v44  ;;  %v824_v43 = vld [vmem:[#allocation8 + $0x120] sm:$0xff]  ;;  %v793_v44 = vld [vmem:[#allocation8 + $0x28] sm:$0xff] }
  0xa1   :  { %v1677_v0 = vadd.s32 4294967169, %v631_v52  ;;  %891 = vmatpush.msra.mxu3 %v824_v43  ;;  %911 = vmatpush.msrb.mxu0 %v793_v44 }
  0xa2   :  { %v170_v57 = vadd.s32 1, %v1668_v49  ;;  %v482_v58 = vadd.s32 1, %v1674_v50  ;;  %v325_v61 = vadd.s32 1, %v1671_v51  ;;  %v825_v50 = vld [vmem:[#allocation8 + $0x128] sm:$0xff]  ;;  %v790_v51 = vld [vmem:[#allocation8 + $0x10] sm:$0xff] }
  0xa3   :  { %v637_v14 = vadd.s32 1, %v1677_v0  ;;  %931 = vmatpush.msrb.mxu1 %v825_v50  ;;  %872 = vmatpush.msra.mxu2 %v790_v51  ;;  %v168_v0 = vor.u32 8388608, %v167_v45 }
  0xa4   :  { %vm171_vm1 = vcmp.gt.s32.totalorder %v170_v57, 0  ;;  %vm483_vm2 = vcmp.gt.s32.totalorder %v482_v58, 0  ;;  %vm326_vm3 = vcmp.gt.s32.totalorder %v325_v61, 0  ;;  %892 = vmatpush.msra.mxu3 %v822_v54  ;;  %912 = vmatpush.msrb.mxu0 %v791_v55 }
  0xa5   :  { %v172_v3 = vsel %vm171_vm1, %v170_v57, 0  ;;  %v484_v4 = vsel %vm483_vm2, %v482_v58, 0  ;;  %v1969_v18 = vsel %vm326_vm3, %v325_v61, 0  ;;  %vm638_vm4 = vcmp.gt.s32.totalorder %v637_v14, 0  ;;  %932 = vmatpush.msrb.mxu1 %v823_v59  ;;  %873 = vmatpush.msra.mxu2 %v788_v60 }
  0xa6   :  { %v1962_v7 = vand.u32 31, %v172_v3  ;;  %v1964_v10 = vand.u32 31, %v484_v4  ;;  %v1977_v35 = vshrl.u32 %v172_v3, 5  ;;  %v1984_v39 = vand.u32 31, %v1969_v18  ;;  %893 = vmatpush.msra.mxu3 %v820_v62  ;;  %913 = vmatpush.msrb.mxu0 %v789_v63 }
  0xa7   :  { %v1986_v42 = vshrl.u32 %v484_v4, 5  ;;  %v1997_v53 = vsel %vm638_vm4, %v637_v14, 0  ;;  %v1883_v3 = vmov 2475754826   ;;  %933 = vmatpush.msrb.mxu1 %v821_v8 }
  0xa8   :  { %v1967_v13 = vsub.s32 32, %v1962_v7  ;;  %v1975_v26 = vsub.s32 32, %v1964_v10  ;;  %v189_v38 = vshll.u32 %v3098_v36, %v1962_v7  ;;  %v186_v47 = vshll.u32 %v3100_v46, %v1962_v7 }
  0xa9   :  { %v498_v52 = vshll.u32 %v3100_v46, %v1964_v10  ;;  %vm195_vm5 = vcmp.lt.s32.totalorder %v1977_v35, 4  ;;  %v2002_v57 = vshll.u32 %v3098_v36, %v1964_v10  ;;  %v2006_v58 = vshll.u32 %v3100_v46, %v1984_v39 }
  0xaa   :  { %v190_v25 = vshrl.u32 %v3097_v24, %v1967_v13  ;;  %v187_v37 = vshrl.u32 %v3098_v36, %v1967_v13  ;;  %v499_v49 = vshrl.u32 %v3098_v36, %v1975_v26  ;;  %v502_v61 = vshrl.u32 %v3097_v24, %v1975_v26 }
  0xab   :  { %vm507_vm6 = vcmp.lt.s32.totalorder %v1986_v42, 4  ;;  %v177_v2 = vshll.u32 %v3103_v1, %v1962_v7  ;;  %v178_v4 = vshrl.u32 %v1883_v3, %v1967_v13  ;;  %v180_v9 = vshll.u32 %v1883_v3, %v1962_v7 }
  0xac   :  { %v191_v48 = vor.u32 %v190_v25, %v189_v38  ;;  %v188_v56 = vor.u32 %v187_v37, %v186_v47  ;;  %v2017_v6 = vor.u32 %v499_v49, %v498_v52  ;;  %v181_v12 = vshrl.u32 %v1884_v11, %v1967_v13 }
  0xad   :  { %v2024_v14 = vsub.s32 32, %v1984_v39  ;;  %v179_v15 = vor.u32 %v178_v4, %v177_v2  ;;  %v183_v16 = vshll.u32 %v1884_v11, %v1962_v7  ;;  %v184_v17 = vshrl.u32 %v3100_v46, %v1967_v13 }
  0xae   :  { %v205_v5 = vsel %vm195_vm5, %v191_v48, 1326507024  ;;  %v201_v21 = vsel %vm195_vm5, %v188_v56, 920167782  ;;  %v176_v22 = vshrl.u32 %v3103_v1, %v1967_v13  ;;  %v182_v25 = vor.u32 %v181_v12, %v180_v9 }
  0xaf   :  { %vm194_vm7 = vcmp.lt.s32.totalorder %v1977_v35, 3  ;;  %v185_v31 = vor.u32 %v184_v17, %v183_v16  ;;  %vm192_vm8 = vcmp.lt.s32.totalorder %v1977_v35, 1  ;;  %v2036_v7 = vshll.u32 %v168_v0, 8 }
  0xb0   :  { %v206_v32 = vsel %vm194_vm7, %v188_v56, %v205_v5  ;;  %v503_v33 = vor.u32 %v502_v61, %v2002_v57  ;;  %vm193_vm9 = vcmp.lt.s32.totalorder %v1977_v35, 2  ;;  %v196_v34 = vsel %vm192_vm8, %v176_v22, %v179_v15 }
  0xb1   :  { %v200_v37 = vsel %vm192_vm8, %v179_v15, %v182_v25  ;;  %v197_v38 = vsel %vm195_vm5, %v185_v31, 2102212464  ;;  %v202_v13 = vsel %vm194_vm7, %v185_v31, %v201_v21  ;;  %v204_v40 = vsel %vm192_vm8, %v182_v25, %v185_v31 }
  0xb2   :  { %v198_v43 = vsel %vm194_vm7, %v182_v25, %v197_v38  ;;  %v203_v44 = vsel %vm193_vm9, %v200_v37, %v202_v13  ;;  %v207_v45 = vsel %vm193_vm9, %v204_v40, %v206_v32  ;;  %v209_v47 = vand.u32 65535, %v2036_v7 }
  0xb3   :  { %v210_v48 = vshrl.u32 %v2036_v7, 16  ;;  %v211_v49 = vand.u32 65535, %v207_v45  ;;  %v212_v50 = vshrl.u32 %v207_v45, 16  ;;  %v233_v51 = vand.u32 65535, %v203_v44 }
  0xb4   :  { %v513_v52 = vsel %vm507_vm6, %v2017_v6, 920167782  ;;  %v2054_v54 = vshrl.u32 %v3098_v36, %v2024_v14  ;;  %v2058_v55 = vshll.u32 %v3098_v36, %v1984_v39  ;;  %v234_v56 = vshrl.u32 %v203_v44, 16 }
  0xb5   :  { %v517_v57 = vsel %vm507_vm6, %v503_v33, 1326507024  ;;  %v214_v59 = vmul.u32 %v212_v50, %v209_v47  ;;  %v215_v60 = vmul.u32 %v211_v49, %v210_v48  ;;  %v489_v61 = vshll.u32 %v3103_v1, %v1964_v10 }
  0xb6   :  { %v2066_v62 = vsel %vm193_vm9, %v196_v34, %v198_v43  ;;  %v236_v63 = vmul.u32 %v234_v56, %v209_v47  ;;  %v237_v0 = vmul.u32 %v233_v51, %v210_v48  ;;  %v479_v2 = vand.u32 8388607, %v472_v41 }
  0xb7   :  { %v213_v4 = vmul.u32 %v211_v49, %v209_v47  ;;  %v216_v5 = vmul.u32 %v212_v50, %v210_v48  ;;  %v217_v8 = vshll.u32 %v214_v59, 16  ;;  %v235_v9 = vmul.u32 %v233_v51, %v209_v47 }
  0xb8   :  { %v218_v12 = vshrl.u32 %v214_v59, 16  ;;  %v219_v15 = vshll.u32 %v215_v60, 16  ;;  %v238_v16 = vmul.u32 %v234_v56, %v210_v48  ;;  %v239_v17 = vshll.u32 %v236_v63, 16 }
  0xb9   :  { %v220_v21 = vshrl.u32 %v215_v60, 16  ;;  %vm221_vm10 = vc.u32 %v213_v4, %v217_v8  ;;  %v223_v22 = vadd.s32 %v217_v8, %v213_v4  ;;  %v490_v35 = vshrl.u32 %v1883_v3, %v1975_v26 }
  0xba   :  { %v1885_v25 = vmov 0   ;;  %v241_v32 = vshll.u32 %v237_v0, 16  ;;  %vm243_vm11 = vc.u32 %v235_v9, %v239_v17  ;;  %v245_v33 = vadd.s32 %v239_v17, %v235_v9 }
  0xbb   :  { %v222_v31 = vsel %vm221_vm10, 1, %v1885_v25  ;;  %vm225_vm12 = vc.u32 %v223_v22, %v219_v15  ;;  %v244_v37 = vsel %vm243_vm11, 1, %v1885_v25  ;;  %v480_v38 = vor.u32 8388608, %v479_v2 }
  0xbc   :  { %v224_v34 = vadd.s32 %v222_v31, %v216_v5  ;;  %v226_v13 = vsel %vm225_vm12, 1, %v1885_v25  ;;  %v246_v40 = vadd.s32 %v244_v37, %v238_v16  ;;  %vm247_vm13 = vc.u32 %v245_v33, %v241_v32 }
  0xbd   :  { %v492_v43 = vshll.u32 %v1883_v3, %v1964_v10  ;;  %v248_v45 = vsel %vm247_vm13, 1, %v1885_v25  ;;  %v2078_v47 = vor.u32 %v490_v35, %v489_v61  ;;  %v493_v48 = vshrl.u32 %v1884_v11, %v1975_v26 }
  0xbe   :  { %v228_v44 = vadd.s32 %v226_v13, %v224_v34  ;;  %v240_v49 = vshrl.u32 %v236_v63, 16  ;;  %v250_v50 = vadd.s32 %v248_v45, %v246_v40  ;;  %v495_v51 = vshll.u32 %v1884_v11, %v1964_v10 }
  0xbf   :  { %v496_v56 = vshrl.u32 %v3100_v46, %v1975_v26  ;;  %v242_v60 = vshrl.u32 %v237_v0, 16  ;;  %v2086_v2 = vor.u32 %v493_v48, %v492_v43  ;;  %vm504_vm14 = vcmp.lt.s32.totalorder %v1986_v42, 1 }
  0xc0   :  { %v229_v59 = vadd.s32 %v228_v44, %v218_v12  ;;  %v251_v4 = vadd.s32 %v250_v50, %v240_v49  ;;  %vm506_vm15 = vcmp.lt.s32.totalorder %v1986_v42, 3  ;;  %v2090_v5 = vshll.u32 %v480_v38, 8 }
  0xc1   :  { %v497_v61 = vor.u32 %v496_v56, %v495_v51  ;;  %v2094_v8 = vadd.s32 %v245_v33, %v241_v32  ;;  %v512_v10 = vsel %vm504_vm14, %v2078_v47, %v2086_v2  ;;  %v518_v0 = vsel %vm506_vm15, %v2017_v6, %v517_v57 }
  0xc2   :  { %v2092_v63 = vadd.s32 %v229_v59, %v220_v21  ;;  %v252_v9 = vadd.s32 %v251_v4, %v242_v60  ;;  %vm505_vm0 = vcmp.lt.s32.totalorder %v1986_v42, 2  ;;  %v2111_v16 = vshrl.u32 %v3097_v24, %v2024_v14 }
  0xc3   :  { %v514_v12 = vsel %vm506_vm15, %v497_v61, %v513_v52  ;;  %v516_v15 = vsel %vm504_vm14, %v2086_v2, %v497_v61  ;;  %v2114_v17 = vand.u32 31, %v1997_v53  ;;  %v253_v52 = vmul.u32 %v2036_v7, %v2066_v62 }
  0xc4   :  { %vm255_vm1 = vc.u32 %v2092_v63, %v2094_v8  ;;  %v515_v6 = vsel %vm505_vm0, %v512_v10, %v514_v12  ;;  %v256_v57 = vadd.s32 1, %v252_v9  ;;  %v519_v21 = vsel %vm505_vm0, %v516_v15, %v518_v0 }
  0xc5   :  { %v521_v22 = vand.u32 65535, %v2090_v5  ;;  %v522_v35 = vshrl.u32 %v2090_v5, 16  ;;  %v523_v31 = vand.u32 65535, %v519_v21  ;;  %v524_v32 = vshrl.u32 %v519_v21, 16 }
  0xc6   :  { %v545_v33 = vand.u32 65535, %v515_v6  ;;  %v257_v34 = vsel %vm255_vm1, %v256_v57, %v252_v9  ;;  %v546_v37 = vshrl.u32 %v515_v6, 16  ;;  %v2127_v38 = vshrl.u32 %v1969_v18, 5 }
  0xc7   :  { %v258_v13 = vadd.s32 %v257_v34, %v253_v52  ;;  %v526_v40 = vmul.u32 %v524_v32, %v521_v22  ;;  %v527_v43 = vmul.u32 %v523_v31, %v522_v35  ;;  %v2131_v7 = vor.u32 %v2054_v54, %v2006_v58 }
  0xc8   :  { %v346_v62 = vor.u32 %v2111_v16, %v2058_v55  ;;  %v548_v44 = vmul.u32 %v546_v37, %v521_v22  ;;  %v549_v45 = vmul.u32 %v545_v33, %v522_v35  ;;  %v2136_v48 = vsub.s32 32, %v2114_v17 }
  0xc9   :  { %v259_v49 = vadd.s32 536870912, %v258_v13  ;;  %v525_v50 = vmul.u32 %v523_v31, %v521_v22  ;;  %v529_v51 = vshll.u32 %v526_v40, 16  ;;  %v509_v18 = vsel %vm507_vm6, %v497_v61, 2102212464 }
  0xca   :  { %v528_v56 = vmul.u32 %v524_v32, %v522_v35  ;;  %v547_v59 = vmul.u32 %v545_v33, %v521_v22  ;;  %v551_v60 = vshll.u32 %v548_v44, 16  ;;  %v531_v58 = vshll.u32 %v527_v43, 16 }
  0xcb   :  { %v2140_v4 = vshrl.u32 %v259_v49, 30  ;;  %vm533_vm2 = vc.u32 %v525_v50, %v529_v51  ;;  %v535_v54 = vadd.s32 %v529_v51, %v525_v50  ;;  %vm350_vm3 = vcmp.lt.s32.totalorder %v2127_v38, 4 }
  0xcc   :  { %v534_v55 = vsel %vm533_vm2, 1, %v1885_v25  ;;  %v553_v10 = vshll.u32 %v549_v45, 16  ;;  %vm555_vm4 = vc.u32 %v547_v59, %v551_v60  ;;  %v557_v0 = vadd.s32 %v551_v60, %v547_v59 }
  0xcd   :  { %v261_v9 = vshll.u32 %v2140_v4, 30  ;;  %v536_v12 = vadd.s32 %v534_v55, %v528_v56  ;;  %vm537_vm5 = vc.u32 %v535_v54, %v531_v58  ;;  %v550_v61 = vmul.u32 %v546_v37, %v522_v35 }
  0xce   :  { %v488_v15 = vshrl.u32 %v3103_v1, %v1975_v26  ;;  %v538_v16 = vsel %vm537_vm5, 1, %v1885_v25  ;;  %v556_v6 = vsel %vm555_vm4, 1, %v1885_v25  ;;  %vm559_vm6 = vc.u32 %v557_v0, %v553_v10 }
  0xcf   :  { %v262_v52 = vsub.s32 %v258_v13, %v261_v9  ;;  %v530_v57 = vshrl.u32 %v526_v40, 16  ;;  %v540_v21 = vadd.s32 %v538_v16, %v536_v12  ;;  %v558_v22 = vadd.s32 %v556_v6, %v550_v61 }
  0xd0   :  { %v508_v31 = vsel %vm504_vm14, %v488_v15, %v2078_v47  ;;  %v510_v35 = vsel %vm506_vm15, %v2086_v2, %v509_v18  ;;  %v560_v32 = vsel %vm559_vm6, 1, %v1885_v25  ;;  %v315_v26 = vand.u32 2147483647, %v1953_v29 }
  0xd1   :  { %vm263_vm7 = vcmp.lt.s32.totalorder %v262_v52, 0  ;;  %v264_v33 = vsub.s32 0, %v262_v52  ;;  %v532_v34 = vshrl.u32 %v527_v43, 16  ;;  %v541_v37 = vadd.s32 %v540_v21, %v530_v57 }
  0xd2   :  { %v552_v13 = vshrl.u32 %v548_v44, 16  ;;  %v562_v40 = vadd.s32 %v560_v32, %v558_v22  ;;  %v332_v49 = vshll.u32 %v3103_v1, %v1984_v39  ;;  %v333_v47 = vshrl.u32 %v1883_v3, %v2024_v14 }
  0xd3   :  { %v265_v50 = vsel %vm263_vm7, %v264_v33, %v262_v52  ;;  %v2161_v51 = vadd.s32 %v541_v37, %v532_v34  ;;  %v554_v2 = vshrl.u32 %v549_v45, 16  ;;  %v335_v18 = vshll.u32 %v1883_v3, %v1984_v39 }
  0xd4   :  { %v266_v56 = vclz %v265_v50  ;;  %v563_v59 = vadd.s32 %v562_v40, %v552_v13  ;;  %v322_v43 = vand.u32 8388607, %v315_v26  ;;  %v336_v44 = vshrl.u32 %v1884_v11, %v2024_v14 }
  0xd5   :  { %v356_v60 = vsel %vm350_vm3, %v2131_v7, 920167782  ;;  %v360_v58 = vsel %vm350_vm3, %v346_v62, 1326507024  ;;  %v511_v45 = vsel %vm505_vm0, %v508_v31, %v510_v35  ;;  %v2176_v54 = vadd.s32 %v557_v0, %v553_v10 }
  0xd6   :  { %v254_v55 = vadd.s32 %v2094_v8, %v2092_v63  ;;  %v1669_v9 = vadd.s32 4294967294, %v266_v56  ;;  %v564_v12 = vadd.s32 %v563_v59, %v554_v2  ;;  %v2180_v61 = vor.u32 %v333_v47, %v332_v49 }
  0xd7   :  { %vm567_vm8 = vc.u32 %v2161_v51, %v2176_v54  ;;  %v2184_v15 = vor.u32 %v336_v44, %v335_v18  ;;  %v338_v62 = vshll.u32 %v1884_v11, %v1984_v39  ;;  %v339_v42 = vshrl.u32 %v3100_v46, %v2024_v14 }
  0xd8   :  { %vm1670_vm9 = vcmp.lt.s32.totalorder %v1669_v9, 0  ;;  %v565_v10 = vmul.u32 %v2090_v5, %v511_v45  ;;  %v568_v0 = vadd.s32 1, %v564_v12  ;;  %v323_v63 = vor.u32 8388608, %v322_v43 }
  0xd9   :  { %v269_v8 = vsel %vm1670_vm9, 0, %v1669_v9  ;;  %v340_v16 = vor.u32 %v339_v42, %v338_v62  ;;  %vm347_vm10 = vcmp.lt.s32.totalorder %v2127_v38, 1  ;;  %vm349_vm11 = vcmp.lt.s32.totalorder %v2127_v38, 3 }
  0xda   :  { %v270_v6 = vsub.s32 32, %v269_v8  ;;  %v274_v57 = vsub.s32 4294967266, %v269_v8  ;;  %v569_v21 = vsel %vm567_vm8, %v568_v0, %v564_v12  ;;  %v361_v39 = vsel %vm349_vm11, %v2131_v7, %v360_v58 }
  0xdb   :  { %v570_v22 = vadd.s32 %v569_v21, %v565_v10  ;;  %vm348_vm12 = vcmp.lt.s32.totalorder %v2127_v38, 2  ;;  %v355_v5 = vsel %vm347_vm10, %v2180_v61, %v2184_v15  ;;  %v359_v31 = vsel %vm347_vm10, %v2184_v15, %v340_v16 }
  0xdc   :  { %v271_v35 = vshll.u32 %v262_v52, %v269_v8  ;;  %v272_v32 = vshrl.u32 %v254_v55, %v270_v6  ;;  %v275_v33 = vadd.s32 127, %v274_v57  ;;  %v357_v34 = vsel %vm349_vm11, %v340_v16, %v356_v60 }
  0xdd   :  { %v2207_v7 = vshrl.u32 %v1997_v53, 5  ;;  %v571_v37 = vadd.s32 536870912, %v570_v22  ;;  %v362_v13 = vsel %vm348_vm12, %v359_v31, %v361_v39  ;;  %v2211_v40 = vshll.u32 %v323_v63, 8 }
  0xde   :  { %vm162_vm13 = vcmp.lt.s32.totalorder %v1947_v27, 0  ;;  %v273_v49 = vor.u32 %v272_v32, %v271_v35  ;;  %v276_v47 = vshll.u32 %v275_v33, 23  ;;  %v366_v50 = vand.u32 65535, %v362_v13 }
  0xdf   :  { %v367_v52 = vshrl.u32 %v362_v13, 16  ;;  %v2216_v2 = vshll.u32 %v3100_v46, %v2114_v17  ;;  %v2218_v18 = vshrl.u32 %v571_v37, 30  ;;  %v358_v53 = vsel %vm348_vm12, %v355_v5, %v357_v34 }
  0xe0   :  { %v364_v56 = vand.u32 65535, %v2211_v40  ;;  %v2225_v59 = vshrl.u32 %v3098_v36, %v2136_v48  ;;  %v2229_v43 = vshll.u32 %v3098_v36, %v2114_v17  ;;  %vm2233_vm14 = vcmp.le.f32.partialorder %v160_v23, 0.7853982 }
  0xe1   :  { %v277_v60 = vor.u32 4788187, %v276_v47  ;;  %v365_v58 = vshrl.u32 %v2211_v40, 16  ;;  %v2240_v45 = vshrl.u32 %v3097_v24, %v2136_v48  ;;  %v284_v55 = vsub.s32 4, %v2140_v4 }
  0xe2   :  { %v573_v9 = vshll.u32 %v2218_v18, 30  ;;  %v369_v12 = vmul.u32 %v367_v52, %v364_v56  ;;  %v280_v42 = vcvt.s32.f32 %v273_v49  ;;  %v389_v23 = vshrl.u32 %v358_v53, 16 }
  0xe3   :  { %v278_v62 = vand.u32 2147483647, %v277_v60  ;;  %v2244_v10 = vmul.u32 %v366_v50, %v365_v58  ;;  %v331_v63 = vshrl.u32 %v3103_v1, %v2024_v14  ;;  %v368_v8 = vmul.u32 %v366_v50, %v364_v56 }
  0xe4   :  { %v2246_v0 = vsub.s32 %v570_v22, %v573_v9  ;;  %v372_v6 = vshll.u32 %v369_v12, 16  ;;  %v352_v21 = vsel %vm350_vm3, %v340_v16, 2102212464  ;;  %v371_v39 = vmul.u32 %v367_v52, %v365_v58 }
  0xe5   :  { %v281_v57 = vmul.f32 %v280_v42, %v278_v62  ;;  %v388_v5 = vand.u32 65535, %v358_v53  ;;  %v374_v35 = vshll.u32 %v2244_v10, 16  ;;  %v391_v14 = vmul.u32 %v389_v23, %v364_v56 }
  0xe6   :  { %vm575_vm15 = vcmp.lt.s32.totalorder %v2246_v0, 0  ;;  %v576_v31 = vsub.s32 0, %v2246_v0  ;;  %vm376_vm0 = vc.u32 %v368_v8, %v372_v6  ;;  %v378_v33 = vadd.s32 %v372_v6, %v368_v8 }
  0xe7   :  { %v282_v22 = vxor.u32 2147483648, %v281_v57  ;;  %v377_v32 = vsel %vm376_vm0, 1, %v1885_v25  ;;  %v2259_v34 = vsel %vm162_vm13, %v284_v55, %v2140_v4  ;;  %v351_v37 = vsel %vm347_vm10, %v331_v63, %v2180_v61 }
  0xe8   :  { %v577_v16 = vsel %vm575_vm15, %v576_v31, %v2246_v0  ;;  %v379_v13 = vadd.s32 %v377_v32, %v371_v39  ;;  %v353_v50 = vsel %vm349_vm11, %v2184_v15, %v352_v21  ;;  %vm380_vm1 = vc.u32 %v378_v33, %v374_v35 }
  0xe9   :  { %v283_v49 = vsel %vm162_vm13, %v282_v22, %v281_v57  ;;  %v578_v47 = vclz %v577_v16  ;;  %v566_v52 = vadd.s32 %v2176_v54, %v2161_v51  ;;  %v390_v53 = vmul.u32 %v388_v5, %v364_v56 }
  0xea   :  { %v2273_v4 = vsel %vm2233_vm14, %v1947_v27, %v283_v49  ;;  %v392_v61 = vmul.u32 %v388_v5, %v365_v58  ;;  %v381_v9 = vsel %vm380_vm1, 1, %v1885_v25  ;;  %v394_v62 = vshll.u32 %v391_v14, 16 }
  0xeb   :  { %v288_v60 = vmul.f32 %v2273_v4, %v2273_v4  ;;  %v1675_v55 = vadd.s32 4294967294, %v578_v47  ;;  %v2282_v15 = vsel %vm348_vm12, %v351_v37, %v353_v50  ;;  %v373_v42 = vshrl.u32 %v369_v12, 16 }
  0xec   :  { %v383_v63 = vadd.s32 %v381_v9, %v379_v13  ;;  %v393_v8 = vmul.u32 %v389_v23, %v365_v58  ;;  %vm398_vm3 = vc.u32 %v390_v53, %v394_v62  ;;  %v396_v54 = vshll.u32 %v392_v61, 16 }
  0xed   :  { %v289_v6 = vmul.f32 -0.001358992, %v288_v60  ;;  %v296_v57 = vmul.f32 -0.00019511016, %v288_v60  ;;  %vm1676_vm2 = vcmp.lt.s32.totalorder %v1675_v55, 0  ;;  %v399_v56 = vsel %vm398_vm3, 1, %v1885_v25 }
  0xee   :  { %v581_v51 = vsel %vm1676_vm2, 0, %v1675_v55  ;;  %v400_v21 = vadd.s32 %v394_v62, %v390_v53  ;;  %v384_v35 = vadd.s32 %v383_v63, %v373_v42  ;;  %v375_v38 = vshrl.u32 %v2244_v10, 16 }
  0xef   :  { %v290_v39 = vadd.f32 0.041655596, %v289_v6  ;;  %v297_v5 = vadd.f32 0.008332121, %v296_v57  ;;  %v582_v31 = vsub.s32 32, %v581_v51  ;;  %v586_v22 = vsub.s32 4294967266, %v581_v51 }
  0xf0   :  { %v401_v32 = vadd.s32 %v399_v56, %v393_v8  ;;  %vm402_vm4 = vc.u32 %v400_v21, %v396_v54  ;;  %vm662_vm5 = vcmp.lt.s32.totalorder %v2207_v7, 4  ;;  %v583_v16 = vshll.u32 %v2246_v0, %v581_v51 }
  0xf1   :  { %v291_v12 = vmul.f32 %v290_v39, %v288_v60  ;;  %v298_v58 = vmul.f32 %v297_v5, %v288_v60  ;;  %v584_v23 = vshrl.u32 %v566_v52, %v582_v31  ;;  %v403_v33 = vsel %vm402_vm4, 1, %v1885_v25 }
  0xf2   :  { %v587_v37 = vadd.s32 127, %v586_v22  ;;  %v395_v13 = vshrl.u32 %v391_v14, 16  ;;  %v405_v49 = vadd.s32 %v403_v33, %v401_v32  ;;  %v596_v50 = vsub.s32 4, %v2218_v18 }
  0xf3   :  { %v292_v47 = vadd.f32 -0.4999988, %v291_v12  ;;  %v2290_v53 = vadd.s32 %v384_v35, %v375_v38  ;;  %v397_v10 = vshrl.u32 %v392_v61, 16  ;;  %v299_v55 = vadd.f32 -0.16666654, %v298_v58 }
  0xf4   :  { %v585_v9 = vor.u32 %v584_v23, %v583_v16  ;;  %v588_v62 = vshll.u32 %v587_v37, 23  ;;  %v406_v42 = vadd.s32 %v405_v49, %v395_v13  ;;  %v655_v52 = vor.u32 %v2225_v59, %v2216_v2 }
  0xf5   :  { %v658_v63 = vor.u32 %v2240_v45, %v2229_v43  ;;  %v2296_v0 = vadd.s32 %v400_v21, %v396_v54  ;;  %v627_v14 = vand.u32 2147483647, %v1956_v30  ;;  %v287_v8 = vsel %vm2233_vm14, 0, %v2259_v34 }
  0xf6   :  { %vm474_vm6 = vcmp.lt.s32.totalorder %v1950_v28, 0  ;;  %v589_v61 = vor.u32 4788187, %v588_v62  ;;  %v407_v6 = vadd.s32 %v406_v42, %v397_v10  ;;  %v293_v57 = vmul.f32 %v292_v47, %v288_v60 }
  0xf7   :  { %v597_v2 = vsel %vm474_vm6, %v596_v50, %v2218_v18  ;;  %v408_v59 = vmul.u32 %v2211_v40, %v2282_v15  ;;  %vm410_vm7 = vc.u32 %v2290_v53, %v2296_v0  ;;  %v300_v43 = vmul.f32 %v299_v55, %v288_v60 }
  0xf8   :  { %v590_v45 = vand.u32 2147483647, %v589_v61  ;;  %v592_v51 = vcvt.s32.f32 %v585_v9  ;;  %v411_v44 = vadd.s32 1, %v407_v6  ;;  %v634_v34 = vand.u32 8388607, %v627_v14 }
  0xf9   :  { %v644_v54 = vshll.u32 %v3103_v1, %v2114_v17  ;;  %v647_v56 = vshll.u32 %v1883_v3, %v2114_v17  ;;  %v648_v18 = vshrl.u32 %v1884_v11, %v2136_v48  ;;  %v645_v60 = vshrl.u32 %v1883_v3, %v2136_v48 }
  0xfa   :  { %v593_v40 = vmul.f32 %v592_v51, %v590_v45  ;;  %v412_v15 = vsel %vm410_vm7, %v411_v44, %v407_v6  ;;  %v650_v21 = vshll.u32 %v1884_v11, %v2114_v17  ;;  %v672_v39 = vsel %vm662_vm5, %v658_v63, 1326507024 }
  0xfb   :  { %v304_v5 = vadd.s32 3, %v287_v8  ;;  %vm2326_vm8 = vcmp.le.f32.partialorder %v472_v41, 0.7853982  ;;  %v413_v35 = vadd.s32 %v412_v15, %v408_v59  ;;  %v2332_v32 = vor.u32 %v648_v18, %v647_v56 }
  0xfc   :  { %v594_v22 = vxor.u32 2147483648, %v593_v40  ;;  %v599_v38 = vsel %vm2326_vm8, 0, %v597_v2  ;;  %v651_v17 = vshrl.u32 %v3100_v46, %v2136_v48  ;;  %v294_v12 = vadd.f32 1.0, %v293_v57 }
  0xfd   :  { %v301_v58 = vadd.f32 1.0, %v300_v43  ;;  %v414_v23 = vadd.s32 536870912, %v413_v35  ;;  %v635_v33 = vor.u32 8388608, %v634_v34  ;;  %v2338_v16 = vor.u32 %v645_v60, %v644_v54  ;;  %v2381_v54 = vpop.eup %1710 }
  0xfe   :  { %v595_v41 = vsel %vm474_vm6, %v594_v22, %v593_v40  ;;  %v2340_v37 = vor.u32 %v651_v17, %v650_v21  ;;  %vm661_vm9 = vcmp.lt.s32.totalorder %v2207_v7, 3  ;;  %vm659_vm10 = vcmp.lt.s32.totalorder %v2207_v7, 1 }
  0xff   :  { %v2346_v13 = vsel %vm2326_vm8, %v1950_v28, %v595_v41  ;;  %v2348_v49 = vshrl.u32 %v414_v23, 30  ;;  %v673_v47 = vsel %vm661_vm9, %v655_v52, %v672_v39  ;;  %v668_v50 = vsel %vm662_vm5, %v655_v52, 920167782 }
 0x100   :  { %v600_v10 = vmul.f32 %v2346_v13, %v2346_v13  ;;  %v671_v55 = vsel %vm659_vm10, %v2332_v32, %v2340_v37  ;;  %v305_v9 = vand.u32 3, %v304_v5  ;;  %v616_v62 = vadd.s32 3, %v599_v38 }
 0x101   :  { %v416_v42 = vshll.u32 %v2348_v49, 30  ;;  %vm660_vm11 = vcmp.lt.s32.totalorder %v2207_v7, 2  ;;  %v302_v63 = vmul.f32 %v301_v58, %v2273_v4  ;;  %v311_v61 = vxor.u32 2147483648, %v294_v12 }
 0x102   :  { %v601_v19 = vmul.f32 -0.001358992, %v600_v10  ;;  %v608_v8 = vmul.f32 -0.00019511016, %v600_v10  ;;  %v674_v52 = vsel %vm660_vm11, %v671_v55, %v673_v47  ;;  %v667_v57 = vsel %vm659_vm10, %v2338_v16, %v2332_v32 }
 0x103   :  { %v2367_v6 = vsub.s32 %v413_v35, %v416_v42  ;;  %v2373_v2 = vshll.u32 %v635_v33, 8  ;;  %v669_v4 = vsel %vm661_vm9, %v2340_v37, %v668_v50  ;;  %v679_v45 = vshrl.u32 %v674_v52, 16 }
 0x104   :  { %v602_v59 = vadd.f32 0.041655596, %v601_v19  ;;  %v609_v43 = vadd.f32 0.008332121, %v608_v8  ;;  %vm306_vm12 = vcmp.lt.s32.totalorder %v305_v9, 2  ;;  %v678_v34 = vand.u32 65535, %v674_v52 }
 0x105   :  { %vm418_vm13 = vcmp.lt.s32.totalorder %v2367_v6, 0  ;;  %v419_v51 = vsub.s32 0, %v2367_v6  ;;  %v676_v44 = vand.u32 65535, %v2373_v2  ;;  %vm307_vm14 = vcmp.eq.s32.totalorder %v305_v9, 0 }
 0x106   :  { %vm310_vm15 = vcmp.eq.s32.totalorder %v305_v9, 2  ;;  %v603_v56 = vmul.f32 %v602_v59, %v600_v10  ;;  %v610_v18 = vmul.f32 %v609_v43, %v600_v10  ;;  %v308_v40 = vxor.u32 2147483648, %v302_v63 }
 0x107   :  { %v420_v15 = vsel %vm418_vm13, %v419_v51, %v2367_v6  ;;  %v677_v60 = vshrl.u32 %v2373_v2, 16  ;;  %v2385_v21 = vmul.u32 %v679_v45, %v676_v44  ;;  %vm303_vm0 = vweird.f32 %v1947_v27 }
 0x108   :  { %v604_v39 = vadd.f32 -0.4999988, %v603_v56  ;;  %v611_v5 = vadd.f32 -0.16666654, %v610_v18  ;;  %v421_v31 = vclz %v420_v15  ;;  %v670_v35 = vsel %vm660_vm11, %v667_v57, %v669_v4 }
 0x109   :  { %v312_v22 = vsel %vm310_vm15, %v311_v61, %v302_v63  ;;  %v617_v38 = vand.u32 3, %v616_v62  ;;  %v680_v17 = vmul.u32 %v678_v34, %v676_v44  ;;  %v2390_v58 = vmul.u32 %v678_v34, %v677_v60 }
 0x10a   :  { %v605_v23 = vmul.f32 %v604_v39, %v600_v10  ;;  %v612_v33 = vmul.f32 %v611_v5, %v600_v10  ;;  %v1672_v41 = vadd.s32 4294967294, %v421_v31  ;;  %v684_v47 = vshll.u32 %v2385_v21, 16 }
 0x10b   :  { %v309_v50 = vsel %vm307_vm14, %v294_v12, %v308_v40  ;;  %v683_v55 = vmul.u32 %v679_v45, %v677_v60  ;;  %v700_v42 = vand.u32 65535, %v670_v35  ;;  %v701_v19 = vshrl.u32 %v670_v35, 16 }
 0x10c   :  { %v606_v8 = vadd.f32 1.0, %v605_v23  ;;  %v613_v52 = vadd.f32 1.0, %v612_v33  ;;  %vm1673_vm1 = vcmp.lt.s32.totalorder %v1672_v41, 0  ;;  %vm688_vm2 = vc.u32 %v680_v17, %v684_v47 }
 0x10d   :  { %v424_v57 = vsel %vm1673_vm1, 0, %v1672_v41  ;;  %v686_v62 = vshll.u32 %v2390_v58, 16  ;;  %v689_v63 = vsel %vm688_vm2, 1, %v1885_v25  ;;  %v690_v61 = vadd.s32 %v684_v47, %v680_v17 }
 0x10e   :  { %v313_v10 = vsel %vm306_vm12, %v309_v50, %v312_v22  ;;  %v614_v59 = vmul.f32 %v613_v52, %v2346_v13  ;;  %vm618_vm3 = vcmp.lt.s32.totalorder %v617_v38, 2  ;;  %v623_v43 = vxor.u32 2147483648, %v606_v8 }
 0x10f   :  { %v429_v12 = vsub.s32 4294967266, %v424_v57  ;;  %v691_v4 = vadd.s32 %v689_v63, %v683_v55  ;;  %vm692_vm4 = vc.u32 %v690_v61, %v686_v62  ;;  %v703_v45 = vmul.u32 %v701_v19, %v676_v44 }
 0x110   :  { %vm619_vm6 = vcmp.eq.s32.totalorder %v617_v38, 0  ;;  %v620_v51 = vxor.u32 2147483648, %v614_v59  ;;  %vm622_vm7 = vcmp.eq.s32.totalorder %v617_v38, 2  ;;  %v693_v34 = vsel %vm692_vm4, 1, %v1885_v25 }
 0x111   :  { %v314_v56 = vsel %vm303_vm0, nan, %v313_v10  ;;  %v425_v18 = vsub.s32 32, %v424_v57  ;;  %v430_v40 = vadd.s32 127, %v429_v12  ;;  %v702_v9 = vmul.u32 %v700_v42, %v676_v44 }
 0x112   :  { %v621_v15 = vsel %vm619_vm6, %v606_v8, %v620_v51  ;;  %v624_v39 = vsel %vm622_vm7, %v623_v43, %v614_v59  ;;  %v704_v13 = vmul.u32 %v700_v42, %v677_v60  ;;  %v706_v5 = vshll.u32 %v703_v45, 16 }
 0x113   :  { %vm615_vm8 = vweird.f32 %v1950_v28  ;;  %v625_v31 = vsel %vm618_vm3, %v621_v15, %v624_v39  ;;  %v409_v35 = vadd.s32 %v2296_v0, %v2290_v53  ;;  %v695_v22 = vadd.s32 %v693_v34, %v691_v4 }
 0x114   :  { %v626_v17 = vsel %vm615_vm8, nan, %v625_v31  ;;  %v431_v23 = vshll.u32 %v430_v40, 23  ;;  %v705_v33 = vmul.u32 %v701_v19, %v677_v60  ;;  %vm710_vm12 = vc.u32 %v702_v9, %v706_v5 }
 0x115   :  { %v782_v27 = vadd.f32 %v626_v17, %v314_v56  ;;  %v685_v41 = vshrl.u32 %v2385_v21, 16  ;;  %v711_v44 = vsel %vm710_vm12, 1, %v1885_v25  ;;  %v427_v47 = vshrl.u32 %v409_v35, %v425_v18 }
 0x116   :  { %v708_v50 = vshll.u32 %v704_v13, 16  ;;  %v712_v55 = vadd.s32 %v706_v5, %v702_v9  ;;  %v713_v42 = vadd.s32 %v711_v44, %v705_v33  ;;  %v643_v38 = vshrl.u32 %v3103_v1, %v2136_v48 }
 0x117   :  { %v784_v28 = vmul.f32 0.05, %v782_v27  ;;  %v696_v8 = vadd.s32 %v695_v22, %v685_v41  ;;  %v426_v53 = vshll.u32 %v2367_v6, %v424_v57  ;;  %v432_v0 = vor.u32 4788187, %v431_v23 }
 0x118   :  { %v664_v60 = vsel %vm662_vm5, %v2340_v37, 2102212464  ;;  %vm714_vm13 = vc.u32 %v712_v55, %v708_v50  ;;  %v687_v19 = vshrl.u32 %v2390_v58, 16  ;;  %v707_v63 = vshrl.u32 %v703_v45, 16 }
 0x119   :  { %v786_v21 = vadd.f32 %v2381_v54, %v784_v28  ;;  %v715_v52 = vsel %vm714_vm13, 1, %v1885_v25  ;;  %v428_v62 = vor.u32 %v427_v47, %v426_v53  ;;  %v663_v48 = vsel %vm659_vm10, %v643_v38, %v2338_v16 }
 0x11a   :  { %v717_v61 = vadd.s32 %v715_v52, %v713_v42  ;;  %v665_v6 = vsel %vm661_vm9, %v2332_v32, %v664_v60  ;;  %v697_v37 = vadd.s32 %v696_v8, %v687_v19  ;;  %v433_v57 = vand.u32 2147483647, %v432_v0 }
 0x11b   :  { %874 = vmatmul.f32.vlgmr.msra.gmra.mxu2 %v786_v21  ;;  %914 = vmatmul.f32.vlgmr.msrb.gmra.mxu0 %v786_v21  ;;  %v709_v54 = vshrl.u32 %v704_v13, 16  ;;  %v716_v58 = vadd.s32 %v712_v55, %v708_v50  ;;  %v435_v59 = vcvt.s32.f32 %v428_v62  ;;  %v666_v43 = vsel %vm660_vm11, %v663_v48, %v665_v6 }
 0x11c   :  { %v718_v10 = vadd.s32 %v717_v61, %v707_v63  ;;  %v720_v16 = vmul.u32 %v2373_v2, %v666_v43  ;;  %vm317_vm9 = vcmp.lt.s32.totalorder %v1953_v29, 0  ;;  %vm2430_vm10 = vcmp.le.f32.partialorder %v315_v26, 0.7853982 }
 0x11d   :  { %vm722_vm5 = vc.u32 %v697_v37, %v716_v58  ;;  %v436_v4 = vmul.f32 %v435_v59, %v433_v57  ;;  %v721_v33 = vadd.s32 %v716_v58, %v697_v37  ;;  %v439_v21 = vsub.s32 4, %v2348_v49 }
 0x11e   :  { %v719_v12 = vadd.s32 %v718_v10, %v709_v54  ;;  %vm629_vm15 = vcmp.lt.s32.totalorder %v1956_v30, 0  ;;  %vm2444_vm0 = vcmp.le.f32.partialorder %v627_v14, 0.7853982  ;;  %vm458_vm4 = vweird.f32 %v1953_v29 }
 0x11f   :  { %v437_v56 = vxor.u32 2147483648, %v436_v4  ;;  %v440_v61 = vsel %vm317_vm9, %v439_v21, %v2348_v49  ;;  %vm770_vm12 = vweird.f32 %v1956_v30 }
 0x120   :  { %v723_v45 = vadd.s32 1, %v719_v12  ;;  %v442_v10 = vsel %vm2430_vm10, 0, %v440_v61  ;;  %v854_v61 = vperm.slane %v852_v20, 0 }
 0x121   :  { %v438_v40 = vsel %vm317_vm9, %v437_v56, %v436_v4  ;;  %v459_v4 = vadd.s32 3, %v442_v10 }
 0x122   :  { %v724_v51 = vsel %vm722_vm5, %v723_v45, %v719_v12  ;;  %v441_v2 = vsel %vm2430_vm10, %v1953_v29, %v438_v40  ;;  %v855_v29 = vperm.slane %v852_v20, 1 }
 0x123   :  { %v725_v34 = vadd.s32 %v724_v51, %v720_v16  ;;  %v443_v13 = vmul.f32 %v441_v2, %v441_v2 }
 0x125   :  { %v726_v32 = vadd.s32 536870912, %v725_v34  ;;  %v451_v35 = vmul.f32 -0.00019511016, %v443_v13  ;;  %v444_v41 = vmul.f32 -0.001358992, %v443_v13 }
 0x127   :  { %v727_v18 = vshrl.u32 %v726_v32, 30  ;;  %v452_v23 = vadd.f32 0.008332121, %v451_v35  ;;  %v445_v38 = vadd.f32 0.041655596, %v444_v41 }
 0x129   :  { %v728_v9 = vshll.u32 %v727_v18, 30  ;;  %v453_v55 = vmul.f32 %v452_v23, %v443_v13  ;;  %v446_v19 = vmul.f32 %v445_v38, %v443_v13  ;;  %v751_v57 = vsub.s32 4, %v727_v18  ;;  %v1713_v38 = vpop.eup %1712 }
 0x12b   :  { %v729_v15 = vsub.s32 %v725_v34, %v728_v9  ;;  %v454_v53 = vadd.f32 -0.16666654, %v453_v55  ;;  %v447_v48 = vadd.f32 -0.4999988, %v446_v19  ;;  %v752_v45 = vsel %vm629_vm15, %v751_v57, %v727_v18 }
 0x12c   :  { %v754_v56 = vsel %vm2444_vm0, 0, %v752_v45  ;;  %v460_v9 = vand.u32 3, %v459_v4 }
 0x12d   :  { %vm730_vm11 = vcmp.lt.s32.totalorder %v729_v15, 0  ;;  %v731_v39 = vsub.s32 0, %v729_v15  ;;  %v455_v62 = vmul.f32 %v454_v53, %v443_v13  ;;  %v448_v59 = vmul.f32 %v447_v48, %v443_v13 }
 0x12e   :  { %vm462_vm1 = vcmp.eq.s32.totalorder %v460_v9, 0  ;;  %vm465_vm2 = vcmp.eq.s32.totalorder %v460_v9, 2  ;;  %vm461_vm3 = vcmp.lt.s32.totalorder %v460_v9, 2 }
 0x12f   :  { %v732_v5 = vsel %vm730_vm11, %v731_v39, %v729_v15  ;;  %v456_v58 = vadd.f32 1.0, %v455_v62  ;;  %v449_v34 = vadd.f32 1.0, %v448_v59 }
 0x130   :  { %v733_v31 = vclz %v732_v5  ;;  %v771_v5 = vadd.s32 3, %v754_v56 }
 0x131   :  { %v457_v14 = vmul.f32 %v456_v58, %v441_v2 }
 0x132   :  { %v1678_v22 = vadd.s32 4294967294, %v733_v31  ;;  %v466_v31 = vxor.u32 2147483648, %v449_v34 }
 0x134   :  { %vm1679_vm14 = vcmp.lt.s32.totalorder %v1678_v22, 0  ;;  %v467_v23 = vsel %vm465_vm2, %v466_v31, %v457_v14 }
 0x135   :  { %v736_v17 = vsel %vm1679_vm14, 0, %v1678_v22 }
 0x136   :  { %v737_v26 = vsub.s32 32, %v736_v17  ;;  %v741_v27 = vsub.s32 4294967266, %v736_v17  ;;  %v738_v44 = vshll.u32 %v729_v15, %v736_v17  ;;  %v463_v15 = vxor.u32 2147483648, %v457_v14 }
 0x137   :  { %v772_v17 = vand.u32 3, %v771_v5 }
 0x138   :  { %v739_v47 = vshrl.u32 %v721_v33, %v737_v26  ;;  %v742_v50 = vadd.s32 127, %v741_v27  ;;  %v464_v22 = vsel %vm462_vm1, %v449_v34, %v463_v15 }
 0x139   :  { %v468_v27 = vsel %vm461_vm3, %v464_v22, %v467_v23  ;;  %vm774_vm6 = vcmp.eq.s32.totalorder %v772_v17, 0  ;;  %vm777_vm7 = vcmp.eq.s32.totalorder %v772_v17, 2  ;;  %vm773_vm8 = vcmp.lt.s32.totalorder %v772_v17, 2 }
 0x13a   :  { %v740_v42 = vor.u32 %v739_v47, %v738_v44  ;;  %v743_v28 = vshll.u32 %v742_v50, 23  ;;  %v469_v44 = vsel %vm458_vm4, nan, %v468_v27 }
 0x13c   :  { %v744_v8 = vor.u32 4788187, %v743_v28  ;;  %v747_v60 = vcvt.s32.f32 %v740_v42 }
 0x13e   :  { %v745_v0 = vand.u32 2147483647, %v744_v8 }
 0x140   :  { %v748_v52 = vmul.f32 %v747_v60, %v745_v0 }
 0x142   :  { %v749_v63 = vxor.u32 2147483648, %v748_v52 }
 0x144   :  { %v750_v37 = vsel %vm629_vm15, %v749_v63, %v748_v52 }
 0x145   :  { %v753_v54 = vsel %vm2444_vm0, %v1956_v30, %v750_v37 }
 0x146   :  { %v755_v49 = vmul.f32 %v753_v54, %v753_v54 }
 0x148   :  { %v756_v43 = vmul.f32 -0.001358992, %v755_v49  ;;  %v763_v12 = vmul.f32 -0.00019511016, %v755_v49 }
 0x14a   :  { %v757_v16 = vadd.f32 0.041655596, %v756_v43  ;;  %v764_v51 = vadd.f32 0.008332121, %v763_v12 }
 0x14c   :  { %v758_v32 = vmul.f32 %v757_v16, %v755_v49  ;;  %v765_v40 = vmul.f32 %v764_v51, %v755_v49 }
 0x14e   :  { %v759_v7 = vadd.f32 -0.4999988, %v758_v32  ;;  %v766_v39 = vadd.f32 -0.16666654, %v765_v40 }
 0x150   :  { %v760_v13 = vmul.f32 %v759_v7, %v755_v49  ;;  %v767_v35 = vmul.f32 %v766_v39, %v755_v49 }
 0x152   :  { %v761_v18 = vadd.f32 1.0, %v760_v13  ;;  %v768_v2 = vadd.f32 1.0, %v767_v35 }
 0x154   :  { %v769_v33 = vmul.f32 %v768_v2, %v753_v54  ;;  %v778_v26 = vxor.u32 2147483648, %v761_v18 }
 0x156   :  { %v775_v41 = vxor.u32 2147483648, %v769_v33  ;;  %v779_v50 = vsel %vm777_vm7, %v778_v26, %v769_v33 }
 0x158   :  { %v776_v47 = vsel %vm774_vm6, %v761_v18, %v775_v41 }
 0x159   :  { %v780_v55 = vsel %vm773_vm8, %v776_v47, %v779_v50 }
 0x15a   :  { %v781_v42 = vsel %vm770_vm12, nan, %v780_v55 }
 0x15b   :  { %v783_v28 = vadd.f32 %v781_v42, %v469_v44 }
 0x15d   :  { %v785_v8 = vmul.f32 0.05, %v783_v28 }
 0x15f   :  { %v787_v53 = vadd.f32 %v1713_v38, %v785_v8 }
 0x161   :  { %894 = vmatmul.f32.vlgmr.msra.gmra.mxu3 %v787_v53  ;;  %934 = vmatmul.f32.vlgmr.msrb.gmra.mxu1 %v787_v53 }
 0x198   :  { %v915_v0 = vpop.f32.mrf.mxu0 }
 0x199   :  { %v916_v60 = vadd.f32 %v915_v0, %v855_v29 }
 0x19e   :  { %v875_v6 = vpop.f32.mrf.mxu2 }
 0x19f   :  { %v876_v58 = vadd.f32 %v875_v6, %v854_v61 }
 0x1de   :  { %v935_v21 = vpop.f32.mrf.mxu1 }
 0x1df   :  { %v2461_v19 = vadd.f32 %v935_v21, %v916_v60 }
 0x1e1   :  { %v2464_v30 = vmul.f32 0.8, %v2461_v19  ;;  %v2467_v52 = vmul.f32 0.2, %v2461_v19  ;;  %1714 = vtanh.f32 %v2461_v19 }
 0x1e3   :  { %v1100_v62 = vand.u32 2139095040, %v2464_v30  ;;  %v1412_v63 = vand.u32 2139095040, %v2467_v52  ;;  %v3096_v54 = vand.u32 2147483647, %v2464_v30  ;;  %v3095_v43 = vand.u32 2147483647, %v2467_v52 }
 0x1e4   :  { %v895_v12 = vpop.f32.mrf.mxu3 }
 0x1e5   :  { %v1101_v48 = vshrl.u32 %v1100_v62, 23  ;;  %v1413_v37 = vshrl.u32 %v1412_v63, 23  ;;  %v1104_v4 = vand.u32 8388607, %v3096_v54  ;;  %v2475_v14 = vadd.f32 %v895_v12, %v876_v58 }
 0x1e6   :  { %v1416_v34 = vand.u32 8388607, %v3095_v43 }
 0x1e7   :  { %v1683_v57 = vadd.s32 4294967169, %v1101_v48  ;;  %v1689_v10 = vadd.s32 4294967169, %v1413_v37  ;;  %3113 = vst [vmem:[#allocation16_spill] sm:$0xff] %v2475_v14  ;;  %v1105_v56 = vor.u32 8388608, %v1104_v4  ;;  %v2482_v9 = vmul.f32 0.8, %v2475_v14 }
 0x1e8   :  { %v1417_v41 = vor.u32 8388608, %v1416_v34  ;;  %v2510_v20 = vmul.f32 0.2, %v2475_v14 }
 0x1e9   :  { %v1107_v49 = vadd.s32 1, %v1683_v57  ;;  %v1419_v59 = vadd.s32 1, %v1689_v10  ;;  %v945_v26 = vand.u32 2139095040, %v2482_v9  ;;  %v2501_v50 = vshll.u32 %v1105_v56, 8 }
 0x1ea   :  { %v2517_v60 = vshll.u32 %v1417_v41, 8  ;;  %v3094_v21 = vand.u32 2147483647, %v2482_v9 }
 0x1eb   :  { %vm1108_vm13 = vcmp.gt.s32.totalorder %v1107_v49, 0  ;;  %vm1420_vm5 = vcmp.gt.s32.totalorder %v1419_v59, 0  ;;  %v946_v38 = vshrl.u32 %v945_v26, 23  ;;  %v2515_v0 = vand.u32 65535, %v2501_v50 }
 0x1ec   :  { %v1109_v45 = vsel %vm1108_vm13, %v1107_v49, 0  ;;  %v1421_v40 = vsel %vm1420_vm5, %v1419_v59, 0  ;;  %v1147_v62 = vshrl.u32 %v2501_v50, 16  ;;  %v2566_v26 = vshrl.u32 %v2517_v60, 16 }
 0x1ed   :  { %v1111_v16 = vand.u32 31, %v1109_v45  ;;  %v2479_v32 = vshrl.u32 %v1109_v45, 5  ;;  %v1423_v17 = vand.u32 31, %v1421_v40  ;;  %v2521_v63 = vshrl.u32 %v1421_v40, 5 }
 0x1ee   :  { %v1680_v10 = vadd.s32 4294967169, %v946_v38 }
 0x1ef   :  { %v1112_v51 = vsub.s32 32, %v1111_v16  ;;  %v1117_v15 = vshll.u32 %v1883_v3, %v1111_v16  ;;  %v1120_v39 = vshll.u32 %v1884_v11, %v1111_v16  ;;  %v1123_v31 = vshll.u32 %v3100_v46, %v1111_v16 }
 0x1f0   :  { %v1126_v35 = vshll.u32 %v3098_v36, %v1111_v16  ;;  %vm1129_vm9 = vcmp.lt.s32.totalorder %v2479_v32, 1  ;;  %vm1132_vm10 = vcmp.lt.s32.totalorder %v2479_v32, 4  ;;  %vm1131_vm11 = vcmp.lt.s32.totalorder %v2479_v32, 3 }
 0x1f1   :  { %v1118_v7 = vshrl.u32 %v1884_v11, %v1112_v51  ;;  %v1121_v5 = vshrl.u32 %v3100_v46, %v1112_v51  ;;  %v1124_v13 = vshrl.u32 %v3098_v36, %v1112_v51  ;;  %v1127_v22 = vshrl.u32 %v3097_v24, %v1112_v51 }
 0x1f2   :  { %v1115_v27 = vshrl.u32 %v1883_v3, %v1112_v51  ;;  %v1114_v55 = vshll.u32 %v3103_v1, %v1111_v16  ;;  %v1424_v28 = vsub.s32 32, %v1423_v17  ;;  %vm1130_vm14 = vcmp.lt.s32.totalorder %v2479_v32, 2 }
 0x1f3   :  { %v1119_v18 = vor.u32 %v1118_v7, %v1117_v15  ;;  %v1122_v2 = vor.u32 %v1121_v5, %v1120_v39  ;;  %v1125_v23 = vor.u32 %v1124_v13, %v1123_v31  ;;  %v1128_v33 = vor.u32 %v1127_v22, %v1126_v35 }
 0x1f4   :  { %v1116_v8 = vor.u32 %v1115_v27, %v1114_v55  ;;  %v1430_v61 = vshrl.u32 %v1884_v11, %v1424_v28  ;;  %v1433_v48 = vshrl.u32 %v3100_v46, %v1424_v28  ;;  %v1113_v6 = vshrl.u32 %v3103_v1, %v1112_v51 }
 0x1f5   :  { %v1141_v44 = vsel %vm1129_vm9, %v1119_v18, %v1122_v2  ;;  %v1142_v47 = vsel %vm1132_vm10, %v1128_v33, 1326507024  ;;  %v1138_v29 = vsel %vm1132_vm10, %v1125_v23, 920167782  ;;  %v1134_v37 = vsel %vm1132_vm10, %v1122_v2, 2102212464 }
 0x1f6   :  { %v1143_v42 = vsel %vm1131_vm11, %v1125_v23, %v1142_v47  ;;  %v1137_v58 = vsel %vm1129_vm9, %v1116_v8, %v1119_v18  ;;  %v1139_v49 = vsel %vm1131_vm11, %v1122_v2, %v1138_v29  ;;  %v1429_v59 = vshll.u32 %v1883_v3, %v1423_v17 }
 0x1f7   :  { %v1144_v53 = vsel %vm1130_vm14, %v1141_v44, %v1143_v42  ;;  %v1432_v12 = vshll.u32 %v1884_v11, %v1423_v17  ;;  %v1435_v4 = vshll.u32 %v3100_v46, %v1423_v17  ;;  %v1436_v45 = vshrl.u32 %v3098_v36, %v1424_v28 }
 0x1f8   :  { %v1149_v57 = vshrl.u32 %v1144_v53, 16  ;;  %v1438_v16 = vshll.u32 %v3098_v36, %v1423_v17  ;;  %v1439_v51 = vshrl.u32 %v3097_v24, %v1424_v28  ;;  %v1133_v34 = vsel %vm1129_vm9, %v1113_v6, %v1116_v8 }
 0x1f9   :  { %v1135_v56 = vsel %vm1131_vm11, %v1119_v18, %v1134_v37  ;;  %v1431_v40 = vor.u32 %v1430_v61, %v1429_v59  ;;  %v1434_v15 = vor.u32 %v1433_v48, %v1432_v12  ;;  %v1427_v39 = vshrl.u32 %v1883_v3, %v1424_v28  ;;  %v1599_v48 = vld [vmem:[#allocation10 + $0xe8] sm:$0xff] }
 0x1fa   :  { %v2543_v7 = vmul.u32 %v1149_v57, %v2515_v0  ;;  %v1437_v5 = vor.u32 %v1436_v45, %v1435_v4  ;;  %v1440_v31 = vor.u32 %v1439_v51, %v1438_v16  ;;  %v1140_v13 = vsel %vm1130_vm14, %v1137_v58, %v1139_v49 }
 0x1fb   :  { %v1426_v35 = vshll.u32 %v3103_v1, %v1423_v17  ;;  %vm1444_vm15 = vcmp.lt.s32.totalorder %v2521_v63, 4  ;;  %v2551_v22 = vand.u32 65535, %v2517_v60  ;;  %v1148_v18 = vand.u32 65535, %v1144_v53 }
 0x1fc   :  { %vm1441_vm0 = vcmp.lt.s32.totalorder %v2521_v63, 1  ;;  %vm1443_vm1 = vcmp.lt.s32.totalorder %v2521_v63, 3  ;;  %v1454_v2 = vsel %vm1444_vm15, %v1440_v31, 1326507024  ;;  %v2559_v23 = vsel %vm1130_vm14, %v1133_v34, %v1135_v56 }
 0x1fd   :  { %v1453_v17 = vsel %vm1441_vm0, %v1431_v40, %v1434_v15  ;;  %v1455_v33 = vsel %vm1443_vm1, %v1437_v5, %v1454_v2  ;;  %v1154_v27 = vshll.u32 %v2543_v7, 16  ;;  %v1170_v41 = vand.u32 65535, %v1140_v13 }
 0x1fe   :  { %v1428_v44 = vor.u32 %v1427_v39, %v1426_v35  ;;  %v952_v47 = vadd.s32 1, %v1680_v10  ;;  %v1171_v55 = vshrl.u32 %v1140_v13, 16  ;;  %vm1442_vm2 = vcmp.lt.s32.totalorder %v2521_v63, 2 }
 0x1ff   :  { %v2572_v32 = vand.u32 8388607, %v3094_v21  ;;  %v3102_v42 = vand.u32 2147483647, %v2510_v20  ;;  %v1150_v38 = vmul.u32 %v1148_v18, %v2515_v0  ;;  %v1450_v8 = vsel %vm1444_vm15, %v1437_v5, 920167782 }
 0x200   :  { %v2580_v53 = vsel %vm1442_vm2, %v1453_v17, %v1455_v33  ;;  %vm953_vm3 = vcmp.gt.s32.totalorder %v952_v47, 0  ;;  %v2582_v29 = vmul.u32 %v1148_v18, %v1147_v62  ;;  %v2584_v61 = vmul.u32 %v1149_v57, %v1147_v62 }
 0x201   :  { %v1425_v6 = vshrl.u32 %v3103_v1, %v1424_v28  ;;  %vm1158_vm4 = vc.u32 %v1150_v38, %v1154_v27  ;;  %v2590_v37 = vmul.u32 %v1170_v41, %v2515_v0  ;;  %v1446_v10 = vsel %vm1444_vm15, %v1434_v15, 2102212464 }
 0x202   :  { %v1449_v58 = vsel %vm1441_vm0, %v1428_v44, %v1431_v40  ;;  %v1451_v49 = vsel %vm1443_vm1, %v1434_v15, %v1450_v8  ;;  %v1461_v57 = vshrl.u32 %v2580_v53, 16  ;;  %v954_v59 = vsel %vm953_vm3, %v952_v47, 0 }
 0x203   :  { %v1257_v12 = vand.u32 2139095040, %v2510_v20  ;;  %v2601_v28 = vmul.u32 %v1171_v55, %v2515_v0  ;;  %v2603_v4 = vmul.u32 %v1170_v41, %v1147_v62  ;;  %v2605_v45 = vmul.u32 %v1171_v55, %v1147_v62  ;;  %v1601_v55 = vld [vmem:[#allocation10 + $0xf8] sm:$0xff] }
 0x204   :  { %v956_v16 = vand.u32 31, %v954_v59  ;;  %v1156_v51 = vshll.u32 %v2582_v29, 16  ;;  %v1159_v34 = vsel %vm1158_vm4, 1, %v1885_v25  ;;  %v2609_v56 = vadd.s32 %v1154_v27, %v1150_v38  ;;  %v1600_v38 = vld [vmem:[#allocation10 + $0xf0] sm:$0xff]  ;;  %1626 = vmatpush.msrb.mxu3 %v1601_v55 }
 0x205   :  { %v1445_v15 = vsel %vm1441_vm0, %v1425_v6, %v1428_v44  ;;  %v1447_v39 = vsel %vm1443_vm1, %v1431_v40, %v1446_v10  ;;  %v2617_v0 = vsel %vm1442_vm2, %v1449_v58, %v1451_v49  ;;  %v1460_v62 = vand.u32 65535, %v2580_v53  ;;  %v1585_v49 = vld [vmem:[#allocation10 + $0x78] sm:$0xff] }
 0x206   :  { %v957_v5 = vsub.s32 32, %v956_v16  ;;  %v2623_v31 = vmul.u32 %v1461_v57, %v2551_v22  ;;  %v2625_v13 = vshrl.u32 %v954_v59, 5  ;;  %v962_v35 = vshll.u32 %v1883_v3, %v956_v16  ;;  %v1584_v59 = vld [vmem:[#allocation10 + $0x70] sm:$0xff]  ;;  %1606 = vmatpush.msrb.mxu2 %v1585_v49  ;;  %1627 = vmatpush.msrb.mxu3 %v1600_v38 }
 0x207   :  { %v1258_v18 = vshrl.u32 %v1257_v12, 23  ;;  %v965_v17 = vshll.u32 %v1884_v11, %v956_v16  ;;  %v968_v27 = vshll.u32 %v3100_v46, %v956_v16  ;;  %v971_v44 = vshll.u32 %v3098_v36, %v956_v16 }
 0x208   :  { %v960_v2 = vshrl.u32 %v1883_v3, %v957_v5  ;;  %v963_v40 = vshrl.u32 %v1884_v11, %v957_v5  ;;  %v966_v33 = vshrl.u32 %v3100_v46, %v957_v5  ;;  %v969_v41 = vshrl.u32 %v3098_v36, %v957_v5  ;;  %1607 = vmatpush.msrb.mxu2 %v1584_v59  ;;  %v1595_v59 = vld [vmem:[#allocation10 + $0xc8] sm:$0xff] }
 0x209   :  { %v972_v47 = vshrl.u32 %v3097_v24, %v957_v5  ;;  %v950_v8 = vor.u32 8388608, %v2572_v32  ;;  %v959_v6 = vshll.u32 %v3103_v1, %v956_v16  ;;  %v1482_v12 = vand.u32 65535, %v2617_v0  ;;  %v1583_v32 = vld [vmem:[#allocation10 + $0x68] sm:$0xff]  ;;  %1628 = vmatpush.msrb.mxu3 %v1599_v48 }
 0x20a   :  { %v964_v10 = vor.u32 %v963_v40, %v962_v35  ;;  %v967_v58 = vor.u32 %v966_v33, %v965_v17  ;;  %v970_v21 = vor.u32 %v969_v41, %v968_v27  ;;  %v1686_v54 = vadd.s32 4294967169, %v1258_v18  ;;  %v1598_v18 = vld [vmem:[#allocation10 + $0xe0] sm:$0xff]  ;;  %1608 = vmatpush.msrb.mxu2 %v1583_v32 }
 0x20b   :  { %v973_v43 = vor.u32 %v972_v47, %v971_v44  ;;  %v1462_v24 = vmul.u32 %v1460_v62, %v2551_v22  ;;  %v1466_v36 = vshll.u32 %v2623_v31, 16  ;;  %v961_v46 = vor.u32 %v960_v2, %v959_v6  ;;  %v1597_v47 = vld [vmem:[#allocation10 + $0xd8] sm:$0xff]  ;;  %1629 = vmatpush.msrb.mxu3 %v1598_v18  ;;  %v1579_v18 = vld [vmem:[#allocation10 + $0x48] sm:$0xff] }
 0x20c   :  { %vm977_vm6 = vcmp.lt.s32.totalorder %v2625_v13, 4  ;;  %v958_v16 = vshrl.u32 %v3103_v1, %v957_v5  ;;  %vm974_vm7 = vcmp.lt.s32.totalorder %v2625_v13, 1  ;;  %vm976_vm8 = vcmp.lt.s32.totalorder %v2625_v13, 3  ;;  %v1582_v5 = vld [vmem:[#allocation10 + $0x60] sm:$0xff] }
 0x20d   :  { %v987_v35 = vsel %vm977_vm6, %v973_v43, 1326507024  ;;  %v979_v40 = vsel %vm977_vm6, %v967_v58, 2102212464  ;;  %v986_v2 = vsel %vm974_vm7, %v964_v10, %v967_v58  ;;  %v1264_v33 = vadd.s32 1, %v1686_v54  ;;  %1609 = vmatpush.msrb.mxu2 %v1582_v5  ;;  %1630 = vmatpush.msrb.mxu3 %v1597_v47  ;;  %v1578_v47 = vld [vmem:[#allocation10 + $0x40] sm:$0xff] }
 0x20e   :  { %v988_v17 = vsel %vm976_vm8, %v970_v21, %v987_v35  ;;  %v2654_v27 = vadd.s32 %v1159_v34, %v2584_v61  ;;  %v2658_v43 = vsel %vm1442_vm2, %v1445_v15, %v1447_v39  ;;  %v1483_v41 = vshrl.u32 %v2617_v0, 16  ;;  %v1581_v61 = vld [vmem:[#allocation10 + $0x58] sm:$0xff]  ;;  %v1596_v39 = vld [vmem:[#allocation10 + $0xd0] sm:$0xff] }
 0x20f   :  { %v2661_v44 = vshll.u32 %v950_v8, 8  ;;  %v2664_v55 = vmul.u32 %v1460_v62, %v2566_v26  ;;  %vm2666_vm12 = vc.u32 %v1462_v24, %v1466_v36  ;;  %vm975_vm13 = vcmp.lt.s32.totalorder %v2625_v13, 2  ;;  %v1580_v8 = vld [vmem:[#allocation10 + $0x50] sm:$0xff]  ;;  %1610 = vmatpush.msrb.mxu2 %v1581_v61  ;;  %1631 = vmatpush.msrb.mxu3 %v1596_v39 }
 0x210   :  { %v978_v63 = vsel %vm974_vm7, %v958_v16, %v961_v46  ;;  %v980_v48 = vsel %vm976_vm8, %v964_v10, %v979_v40  ;;  %v983_v34 = vsel %vm977_vm6, %v970_v21, 920167782  ;;  %v2679_v15 = vsel %vm975_vm13, %v986_v2, %v988_v17  ;;  %v1594_v2 = vld [vmem:[#allocation10 + $0xc0] sm:$0xff] }
 0x211   :  { %vm1265_vm5 = vcmp.gt.s32.totalorder %v1264_v33, 0  ;;  %v1465_v0 = vmul.u32 %v1461_v57, %v2566_v26  ;;  %v2685_v62 = vmul.u32 %v1482_v12, %v2551_v22  ;;  %v1261_v21 = vand.u32 8388607, %v3102_v42  ;;  %1611 = vmatpush.msrb.mxu2 %v1580_v8  ;;  %1632 = vmatpush.msrb.mxu3 %v1595_v59 }
 0x212   :  { %v1471_v6 = vsel %vm2666_vm12, 1, %v1885_v25  ;;  %v2695_v49 = vmul.u32 %v1483_v41, %v2551_v22  ;;  %v2698_v53 = vmul.u32 %v1482_v12, %v2566_v26  ;;  %v982_v57 = vsel %vm974_vm7, %v961_v46, %v964_v10 }
 0x213   :  { %v2704_v32 = vsel %vm975_vm13, %v978_v63, %v980_v48  ;;  %v984_v16 = vsel %vm976_vm8, %v967_v58, %v983_v34  ;;  %v994_v35 = vshrl.u32 %v2679_v15, 16  ;;  %v1266_v22 = vsel %vm1265_vm5, %v1264_v33, 0  ;;  %1612 = vmatpush.msrb.mxu2 %v1579_v18  ;;  %1633 = vmatpush.msrb.mxu3 %v1594_v2  ;;  %v1577_v48 = vld [vmem:[#allocation10 + $0x38] sm:$0xff]  ;;  %v1576_v18 = vld [vmem:[#allocation10 + $0x30] sm:$0xff]  ;;  %v1574_v34 = vld [vmem:[#allocation10 + $0x20] sm:$0xff] }
 0x214   :  { %v2712_v40 = vmul.u32 %v1483_v41, %v2566_v26  ;;  %v2715_v46 = vand.u32 65535, %v2661_v44  ;;  %v1268_v10 = vand.u32 31, %v1266_v22  ;;  %v2717_v17 = vadd.s32 %v1466_v36, %v1462_v24  ;;  %v1593_v24 = vld [vmem:[#allocation10 + $0xb8] sm:$0xff] }
 0x215   :  { %v2719_v58 = vadd.s32 %v1471_v6, %v1465_v0  ;;  %v2722_v5 = vshrl.u32 %v2661_v44, 16  ;;  %v1262_v33 = vor.u32 8388608, %v1261_v21  ;;  %v2726_v26 = vsel %vm975_vm13, %v982_v57, %v984_v16  ;;  %v1592_v57 = vld [vmem:[#allocation10 + $0xb0] sm:$0xff]  ;;  %1613 = vmatpush.msrb.mxu2 %v1578_v47  ;;  %1634 = vmatpush.msrb.mxu3 %v1593_v24  ;;  %v1591_v47 = vld [vmem:[#allocation10 + $0xa8] sm:$0xff] }
 0x216   :  { %v993_v41 = vand.u32 65535, %v2679_v15  ;;  %v2731_v63 = vsub.s32 32, %v1268_v10  ;;  %v2736_v36 = vmul.u32 %v994_v35, %v2715_v46  ;;  %v2738_v61 = vshrl.u32 %v1266_v22, 5 }
 0x217   :  { %v1274_v13 = vshll.u32 %v1883_v3, %v1268_v10  ;;  %vm2744_vm9 = vc.u32 %v2609_v56, %v1156_v51  ;;  %v1277_v21 = vshll.u32 %v1884_v11, %v1268_v10  ;;  %v3118_v8 = vmov 2102212464   ;;  %1614 = vmatpush.msrb.mxu2 %v1577_v48  ;;  %1635 = vmatpush.msrb.mxu3 %v1592_v57 }
 0x218   :  { %v1272_v39 = vshrl.u32 %v1883_v3, %v2731_v63  ;;  %v1275_v0 = vshrl.u32 %v1884_v11, %v2731_v63  ;;  %v1278_v6 = vshrl.u32 %v3118_v8, %v2731_v63  ;;  %v1280_v59 = vshll.u32 %v3118_v8, %v1268_v10 }
 0x219   :  { %v3119_v51 = vmov 920167782   ;;  %v3120_v22 = vmov 1326507024   ;;  %v1271_v2 = vshll.u32 %v3103_v1, %v1268_v10  ;;  %v2766_v54 = vshll.u32 %v1262_v33, 8  ;;  %v1590_v33 = vld [vmem:[#allocation10 + $0xa0] sm:$0xff]  ;;  %1615 = vmatpush.msrb.mxu2 %v1576_v18  ;;  %1636 = vmatpush.msrb.mxu3 %v1591_v47 }
 0x21a   :  { %v1281_v56 = vshrl.u32 %v3119_v51, %v2731_v63  ;;  %v1283_v16 = vshll.u32 %v3119_v51, %v1268_v10  ;;  %v1284_v3 = vshrl.u32 %v3120_v22, %v2731_v63  ;;  %v2762_v11 = vor.u32 %v1275_v0, %v1274_v13  ;;  %v1575_v51 = vld [vmem:[#allocation10 + $0x28] sm:$0xff]  ;;  %v1573_v18 = vld [vmem:[#allocation10 + $0x18] sm:$0xff] }
 0x21b   :  { %v2764_v42 = vor.u32 %v1278_v6, %v1277_v21  ;;  %v1015_v8 = vand.u32 65535, %v2726_v26  ;;  %v1163_v24 = vsel %vm2744_vm9, 1, %v1885_v25  ;;  %v995_v10 = vmul.u32 %v993_v41, %v2715_v46  ;;  %1616 = vmatpush.msrb.mxu2 %v1575_v51  ;;  %1637 = vmatpush.msrb.mxu3 %v1590_v33 }
 0x21c   :  { %v1282_v38 = vor.u32 %v1281_v56, %v1280_v59  ;;  %v1285_v12 = vor.u32 %v1284_v3, %v1283_v16  ;;  %v999_v13 = vshll.u32 %v2736_v36, 16  ;;  %v2774_v0 = vor.u32 %v1272_v39, %v1271_v2  ;;  %v1589_v59 = vld [vmem:[#allocation10 + $0x98] sm:$0xff] }
 0x21d   :  { %vm1289_vm10 = vcmp.lt.s32.totalorder %v2738_v61, 4  ;;  %vm1286_vm11 = vcmp.lt.s32.totalorder %v2738_v61, 1  ;;  %vm1288_vm14 = vcmp.lt.s32.totalorder %v2738_v61, 3  ;;  %v1176_v21 = vshll.u32 %v2601_v28, 16  ;;  %1617 = vmatpush.msrb.mxu2 %v1574_v34  ;;  %1638 = vmatpush.msrb.mxu3 %v1589_v59  ;;  %v1586_v59 = vld [vmem:[#allocation10 + $0x80] sm:$0xff] }
 0x21e   :  { %v1299_v48 = vsel %vm1289_vm10, %v1285_v12, 1326507024  ;;  %v1295_v6 = vsel %vm1289_vm10, %v1282_v38, 920167782  ;;  %v1298_v39 = vsel %vm1286_vm11, %v2762_v11, %v2764_v42  ;;  %v1165_v56 = vadd.s32 %v1163_v24, %v2654_v27 }
 0x21f   :  { %v1300_v57 = vsel %vm1288_vm14, %v1282_v38, %v1299_v48  ;;  %v2792_v12 = vmul.u32 %v993_v41, %v2722_v5  ;;  %v1016_v16 = vshrl.u32 %v2726_v26, 16  ;;  %v2796_v22 = vand.u32 65535, %v2766_v54  ;;  %v1588_v38 = vld [vmem:[#allocation10 + $0x90] sm:$0xff]  ;;  %v1587_v48 = vld [vmem:[#allocation10 + $0x88] sm:$0xff]  ;;  %1618 = vmatpush.msrb.mxu2 %v1573_v18 }
 0x220   :  { %v2799_v3 = vshrl.u32 %v2766_v54, 16  ;;  %vm2801_vm15 = vc.u32 %v995_v10, %v999_v13  ;;  %vm1287_vm0 = vcmp.lt.s32.totalorder %v2738_v61, 2  ;;  %v1294_v27 = vsel %vm1286_vm11, %v2774_v0, %v2762_v11  ;;  %1639 = vmatpush.msrb.mxu3 %v1588_v38 }
 0x221   :  { %v1155_v26 = vshrl.u32 %v2543_v7, 16  ;;  %v1296_v41 = vsel %vm1288_vm14, %v2764_v42, %v1295_v6  ;;  %v2816_v47 = vsel %vm1287_vm0, %v1298_v39, %v1300_v57  ;;  %vm2819_vm1 = vc.u32 %v2590_v37, %v1176_v21 }
 0x222   :  { %v1182_v24 = vadd.s32 %v1176_v21, %v2590_v37  ;;  %v998_v7 = vmul.u32 %v994_v35, %v2722_v5  ;;  %v2828_v33 = vmul.u32 %v1015_v8, %v2715_v46  ;;  %v1178_v6 = vshll.u32 %v2603_v4, 16  ;;  %1640 = vmatpush.msrb.mxu3 %v1587_v48 }
 0x223   :  { %v1166_v34 = vadd.s32 %v1165_v56, %v1155_v26  ;;  %v1004_v39 = vsel %vm2801_vm15, 1, %v1885_v25  ;;  %v2835_v57 = vmul.u32 %v1016_v16, %v2715_v46  ;;  %v2838_v37 = vmul.u32 %v1015_v8, %v2722_v5 }
 0x224   :  { %v1157_v15 = vshrl.u32 %v2582_v29, 16  ;;  %v2843_v35 = vsel %vm1287_vm0, %v1294_v27, %v1296_v41  ;;  %v1305_v21 = vand.u32 65535, %v2816_v47  ;;  %v1181_v56 = vsel %vm2819_vm1, 1, %v1885_v25  ;;  %1641 = vmatpush.msrb.mxu3 %v1586_v59 }
 0x225   :  { %vm1184_vm2 = vc.u32 %v1182_v24, %v1178_v6  ;;  %v1001_v46 = vshll.u32 %v2792_v12, 16  ;;  %v1020_v8 = vmul.u32 %v1016_v16, %v2722_v5  ;;  %v1183_v18 = vadd.s32 %v1181_v56, %v2605_v45 }
 0x226   :  { %v1185_v29 = vsel %vm1184_vm2, 1, %v1885_v25  ;;  %v1005_v2 = vadd.s32 %v999_v13, %v995_v10  ;;  %v1006_v27 = vadd.s32 %v1004_v39, %v998_v7  ;;  %v2853_v38 = vadd.s32 %v1166_v34, %v1157_v15 }
 0x227   :  { %v1177_v26 = vshrl.u32 %v2601_v28, 16  ;;  %v1306_v41 = vshrl.u32 %v2816_v47, 16  ;;  %v1327_v51 = vand.u32 65535, %v2843_v35  ;;  %v1328_v1 = vshrl.u32 %v2843_v35, 16 }
 0x228   :  { %v1187_v14 = vadd.s32 %v1185_v29, %v1183_v18  ;;  %v1307_v5 = vmul.u32 %v1305_v21, %v2796_v22  ;;  %v1179_v45 = vshrl.u32 %v2603_v4, 16  ;;  %v3125_v16 = vshll.u32 %v2664_v55, 16 }
 0x229   :  { %v1488_v10 = vshll.u32 %v2695_v49, 16  ;;  %v2865_v13 = vadd.s32 %v1182_v24, %v1178_v6  ;;  %v1467_v47 = vshrl.u32 %v2623_v31, 16  ;;  %v1490_v34 = vshll.u32 %v2698_v53, 16 }
 0x22a   :  { %vm1474_vm3 = vc.u32 %v2717_v17, %v3125_v16  ;;  %v1188_v28 = vadd.s32 %v1187_v14, %v1177_v26  ;;  %v2874_v39 = vmul.u32 %v1306_v41, %v2796_v22  ;;  %v2877_v17 = vmul.u32 %v1305_v21, %v2799_v3 }
 0x22b   :  { %v1475_v7 = vsel %vm1474_vm3, 1, %v1885_v25  ;;  %vm1492_vm4 = vc.u32 %v2685_v62, %v1488_v10  ;;  %v1494_v4 = vadd.s32 %v1488_v10, %v2685_v62  ;;  %vm1192_vm6 = vc.u32 %v2853_v38, %v2865_v13 }
 0x22c   :  { %v1477_v48 = vadd.s32 %v1475_v7, %v2719_v58  ;;  %v1189_v24 = vadd.s32 %v1188_v28, %v1179_v45  ;;  %v1493_v14 = vsel %vm1492_vm4, 1, %v1885_v25  ;;  %v1469_v15 = vshrl.u32 %v2664_v55, 16 }
 0x22d   :  { %v1495_v58 = vadd.s32 %v1493_v14, %v2712_v40  ;;  %vm1496_vm7 = vc.u32 %v1494_v4, %v1490_v34  ;;  %vm1007_vm8 = vc.u32 %v1005_v2, %v1001_v46  ;;  %v1489_v59 = vshrl.u32 %v2695_v49, 16 }
 0x22e   :  { %v1478_v31 = vadd.s32 %v1477_v48, %v1467_v47  ;;  %v1193_v6 = vadd.s32 1, %v1189_v24  ;;  %v1497_v62 = vsel %vm1496_vm7, 1, %v1885_v25  ;;  %v1008_v56 = vsel %vm1007_vm8, 1, %v1885_v25 }
 0x22f   :  { %v1499_v21 = vadd.s32 %v1497_v62, %v1495_v58  ;;  %v1021_v18 = vshll.u32 %v2835_v57, 16  ;;  %v1311_v29 = vshll.u32 %v2874_v39, 16  ;;  %v1010_v40 = vadd.s32 %v1008_v56, %v1006_v27 }
 0x230   :  { %v1194_v26 = vsel %vm1192_vm6, %v1193_v6, %v1189_v24  ;;  %v2889_v45 = vadd.s32 %v1478_v31, %v1469_v15  ;;  %v3126_v16 = vmul.u32 %v2501_v50, %v2559_v23  ;;  %v1491_v10 = vshrl.u32 %v2698_v53, 16 }
 0x231   :  { %v1500_v46 = vadd.s32 %v1499_v21, %v1489_v59  ;;  %v1000_v49 = vshrl.u32 %v2736_v36, 16  ;;  %v2896_v2 = vadd.s32 %v1494_v4, %v1490_v34  ;;  %v1023_v28 = vshll.u32 %v2838_v37, 16 }
 0x232   :  { %v1195_v55 = vadd.s32 %v1194_v26, %v3126_v16  ;;  %vm1025_vm12 = vc.u32 %v2828_v33, %v1021_v18  ;;  %v1027_v47 = vadd.s32 %v1021_v18, %v2828_v33  ;;  %v2905_v50 = vmul.u32 %v1328_v1, %v2796_v22 }
 0x233   :  { %v1501_v48 = vadd.s32 %v1500_v46, %v1491_v10  ;;  %v1011_v27 = vadd.s32 %v1010_v40, %v1000_v49  ;;  %v1026_v24 = vsel %vm1025_vm12, 1, %v1885_v25  ;;  %vm1504_vm13 = vc.u32 %v2889_v45, %v2896_v2 }
 0x234   :  { %v1196_v7 = vadd.s32 536870912, %v1195_v55  ;;  %v1028_v23 = vadd.s32 %v1026_v24, %v1020_v8  ;;  %vm1029_vm5 = vc.u32 %v1027_v47, %v1023_v28  ;;  %v1002_v33 = vshrl.u32 %v2792_v12, 16 }
 0x235   :  { %v1505_v36 = vadd.s32 1, %v1501_v48  ;;  %v1030_v34 = vsel %vm1029_vm5, 1, %v1885_v25  ;;  %v1310_v4 = vmul.u32 %v1306_v41, %v2799_v3  ;;  %v1317_v14 = vadd.s32 %v1311_v29, %v1307_v5 }
 0x236   :  { %v2909_v53 = vshrl.u32 %v1196_v7, 30  ;;  %v1022_v31 = vshrl.u32 %v2835_v57, 16  ;;  %v1032_v58 = vadd.s32 %v1030_v34, %v1028_v23  ;;  %vm1315_vm9 = vc.u32 %v1307_v5, %v1311_v29 }
 0x237   :  { %v1506_v15 = vsel %vm1504_vm13, %v1505_v36, %v1501_v48  ;;  %v2916_v62 = vadd.s32 %v1011_v27, %v1002_v33  ;;  %v1313_v8 = vshll.u32 %v2877_v17, 16  ;;  %v3127_v59 = vmul.u32 %v2517_v60, %v2658_v43 }
 0x238   :  { %v1198_v6 = vshll.u32 %v2909_v53, 30  ;;  %v1024_v21 = vshrl.u32 %v2838_v37, 16  ;;  %v1033_v56 = vadd.s32 %v1032_v58, %v1022_v31  ;;  %v1329_v57 = vmul.u32 %v1327_v51, %v2796_v22 }
 0x239   :  { %v1507_v12 = vadd.s32 %v1506_v15, %v3127_v59  ;;  %v2926_v5 = vadd.s32 %v1027_v47, %v1023_v28  ;;  %v1333_v18 = vshll.u32 %v2905_v50, 16  ;;  %v1316_v29 = vsel %vm1315_vm9, 1, %v1885_v25 }
 0x23a   :  { %v1199_v41 = vsub.s32 %v1195_v55, %v1198_v6  ;;  %v1034_v40 = vadd.s32 %v1033_v56, %v1024_v21  ;;  %vm1319_vm15 = vc.u32 %v1317_v14, %v1313_v8  ;;  %v2933_v60 = vmul.u32 %v1327_v51, %v2799_v3 }
 0x23b   :  { %v1508_v26 = vadd.s32 536870912, %v1507_v12  ;;  %vm1037_vm2 = vc.u32 %v2916_v62, %v2926_v5  ;;  %v3128_v22 = vmov 683565275   ;;  %v1291_v16 = vsel %vm1289_vm10, %v2764_v42, 2102212464 }
 0x23c   :  { %vm1200_vm1 = vcmp.lt.s32.totalorder %v1199_v41, 0  ;;  %v1201_v43 = vsub.s32 0, %v1199_v41  ;;  %v1270_v37 = vshrl.u32 %v3128_v22, %v2731_v63  ;;  %v1038_v10 = vadd.s32 1, %v1034_v40 }
 0x23d   :  { %v2942_v55 = vshrl.u32 %v1508_v26, 30  ;;  %v1318_v46 = vadd.s32 %v1316_v29, %v1310_v4  ;;  %v1320_v51 = vsel %vm1319_vm15, 1, %v1885_v25  ;;  %v1339_v28 = vadd.s32 %v1333_v18, %v1329_v57 }
 0x23e   :  { %v1202_v49 = vsel %vm1200_vm1, %v1201_v43, %v1199_v41  ;;  %v1039_v48 = vsel %vm1037_vm2, %v1038_v10, %v1034_v40  ;;  %vm1337_vm3 = vc.u32 %v1329_v57, %v1333_v18  ;;  %v1290_v63 = vsel %vm1286_vm11, %v1270_v37, %v2774_v0 }
 0x23f   :  { %v1203_v47 = vclz %v1202_v49  ;;  %v1510_v7 = vshll.u32 %v2942_v55, 30  ;;  %v3129_v42 = vmul.u32 %v2661_v44, %v2704_v32  ;;  %v1335_v24 = vshll.u32 %v2933_v60, 16 }
 0x240   :  { %v1292_v23 = vsel %vm1288_vm14, %v2762_v11, %v1291_v16  ;;  %v1332_v36 = vmul.u32 %v1328_v1, %v2799_v3  ;;  %v1322_v14 = vadd.s32 %v1320_v51, %v1318_v46  ;;  %v1338_v0 = vsel %vm1337_vm3, 1, %v1885_v25 }
 0x241   :  { %v1040_v27 = vadd.s32 %v1039_v48, %v3129_v42  ;;  %v1684_v33 = vadd.s32 4294967294, %v1203_v47  ;;  %v1511_v34 = vsub.s32 %v1507_v12, %v1510_v7  ;;  %vm1341_vm10 = vc.u32 %v1339_v28, %v1335_v24 }
 0x242   :  { %v1312_v32 = vshrl.u32 %v2874_v39, 16  ;;  %v1340_v11 = vadd.s32 %v1338_v0, %v1332_v36  ;;  %v1342_v6 = vsel %vm1341_vm10, 1, %v1885_v25  ;;  %v1191_v1 = vadd.s32 %v2865_v13, %v2853_v38 }
 0x243   :  { %v1041_v4 = vadd.s32 536870912, %v1040_v27  ;;  %vm1685_vm11 = vcmp.lt.s32.totalorder %v1684_v33, 0  ;;  %vm1512_vm4 = vcmp.lt.s32.totalorder %v1511_v34, 0  ;;  %v1513_v44 = vsub.s32 0, %v1511_v34 }
 0x244   :  { %v1206_v31 = vsel %vm1685_vm11, 0, %v1684_v33  ;;  %v1323_v12 = vadd.s32 %v1322_v14, %v1312_v32  ;;  %v1344_v39 = vadd.s32 %v1342_v6, %v1340_v11  ;;  %v1293_v18 = vsel %vm1287_vm0, %v1290_v63, %v1292_v23 }
 0x245   :  { %v2961_v58 = vshrl.u32 %v1041_v4, 30  ;;  %v1207_v3 = vsub.s32 32, %v1206_v31  ;;  %v1211_v35 = vsub.s32 4294967266, %v1206_v31  ;;  %v1514_v15 = vsel %vm1512_vm4, %v1513_v44, %v1511_v34 }
 0x246   :  { %v1515_v8 = vclz %v1514_v15  ;;  %v1208_v21 = vshll.u32 %v1199_v41, %v1206_v31  ;;  %v1334_v25 = vshrl.u32 %v2905_v50, 16  ;;  %v1314_v13 = vshrl.u32 %v2877_v17, 16 }
 0x247   :  { %v1043_v59 = vshll.u32 %v2961_v58, 30  ;;  %v1209_v56 = vshrl.u32 %v1191_v1, %v1207_v3  ;;  %v1212_v57 = vadd.s32 127, %v1211_v35  ;;  %v1503_v43 = vadd.s32 %v2896_v2, %v2889_v45 }
 0x248   :  { %v1690_v29 = vadd.s32 4294967294, %v1515_v8  ;;  %v1336_v41 = vshrl.u32 %v2933_v60, 16  ;;  %v1345_v22 = vadd.s32 %v1344_v39, %v1334_v25  ;;  %v2977_v61 = vadd.s32 %v1323_v12, %v1314_v13 }
 0x249   :  { %v1210_v26 = vor.u32 %v1209_v56, %v1208_v21  ;;  %v1213_v40 = vshll.u32 %v1212_v57, 23  ;;  %v2970_v38 = vsub.s32 %v1040_v27, %v1043_v59  ;;  %v1221_v50 = vsub.s32 4, %v2909_v53 }
 0x24a   :  { %vm1691_vm14 = vcmp.lt.s32.totalorder %v1690_v29, 0  ;;  %v2981_v47 = vadd.s32 %v1339_v28, %v1335_v24  ;;  %v1346_v45 = vadd.s32 %v1345_v22, %v1336_v41  ;;  %vm1099_vm7 = vcmp.lt.s32.totalorder %v2464_v30, 0  ;;  %v1570_v22 = vld [vmem:[#allocation10] sm:$0xff] }
 0x24b   :  { %v1214_v37 = vor.u32 4788187, %v1213_v40  ;;  %v1518_v16 = vsel %vm1691_vm14, 0, %v1690_v29  ;;  %vm1045_vm0 = vcmp.lt.s32.totalorder %v2970_v38, 0  ;;  %v1046_v49 = vsub.s32 0, %v2970_v38  ;;  %v1571_v29 = vld [vmem:[#allocation10 + $0x8] sm:$0xff] }
 0x24c   :  { %v1519_v10 = vsub.s32 32, %v1518_v16  ;;  %v1523_v46 = vsub.s32 4294967266, %v1518_v16  ;;  %v1217_v51 = vcvt.s32.f32 %v1210_v26  ;;  %v1520_v2 = vshll.u32 %v1511_v34, %v1518_v16 }
 0x24d   :  { %v1215_v17 = vand.u32 2147483647, %v1214_v37  ;;  %v1047_v48 = vsel %vm1045_vm0, %v1046_v49, %v2970_v38  ;;  %vm1349_vm6 = vc.u32 %v2977_v61, %v2981_v47  ;;  %v1350_v27 = vadd.s32 1, %v1346_v45 }
 0x24e   :  { %v1521_v60 = vshrl.u32 %v1503_v43, %v1519_v10  ;;  %v1524_v7 = vadd.s32 127, %v1523_v46  ;;  %v1048_v42 = vclz %v1047_v48  ;;  %v1347_v33 = vmul.u32 %v2766_v54, %v1293_v18  ;;  %v1572_v18 = vld [vmem:[#allocation10 + $0x10] sm:$0xff] }
 0x24f   :  { %v1218_v63 = vmul.f32 %v1217_v51, %v1215_v17  ;;  %vm1411_vm8 = vcmp.lt.s32.totalorder %v2467_v52, 0  ;;  %v3130_v34 = vand.u32 2147483647, %v2464_v30  ;;  %v1351_v0 = vsel %vm1349_vm6, %v1350_v27, %v1346_v45  ;;  %1619 = vmatpush.msrb.mxu2 %v1572_v18 }
 0x250   :  { %v1522_v23 = vor.u32 %v1521_v60, %v1520_v2  ;;  %v1525_v36 = vshll.u32 %v1524_v7, 23  ;;  %v1681_v24 = vadd.s32 4294967294, %v1048_v42  ;;  %v1222_v32 = vsel %vm1099_vm7, %v1221_v50, %v2909_v53 }
 0x251   :  { %v1219_v28 = vxor.u32 2147483648, %v1218_v63  ;;  %vm2991_vm12 = vcmp.le.f32.partialorder %v3130_v34, 0.7853982  ;;  %v1352_v31 = vadd.s32 %v1351_v0, %v1347_v33  ;;  %v1036_v35 = vadd.s32 %v2926_v5, %v2916_v62  ;;  %1620 = vmatpush.msrb.mxu2 %v1571_v29 }
 0x252   :  { %v1526_v14 = vor.u32 4788187, %v1525_v36  ;;  %vm1682_vm13 = vcmp.lt.s32.totalorder %v1681_v24, 0  ;;  %v1529_v6 = vcvt.s32.f32 %v1522_v23  ;;  %v1224_v53 = vsel %vm2991_vm12, 0, %v1222_v32 }
 0x253   :  { %v1220_v44 = vsel %vm1099_vm7, %v1219_v28, %v1218_v63  ;;  %v1051_v1 = vsel %vm1682_vm13, 0, %v1681_v24  ;;  %v3133_v59 = vand.u32 2147483647, %v2467_v52  ;;  %v1353_v56 = vadd.s32 536870912, %v1352_v31  ;;  %1621 = vmatpush.msrb.mxu2 %v1570_v22 }
 0x254   :  { %v2999_v54 = vsel %vm2991_vm12, %v2464_v30, %v1220_v44  ;;  %v1527_v11 = vand.u32 2147483647, %v1526_v14  ;;  %v1052_v15 = vsub.s32 32, %v1051_v1  ;;  %v1056_v8 = vsub.s32 4294967266, %v1051_v1 }
 0x255   :  { %v1225_v3 = vmul.f32 %v2999_v54, %v2999_v54  ;;  %vm3009_vm5 = vcmp.le.f32.partialorder %v3133_v59, 0.7853982  ;;  %v1053_v62 = vshll.u32 %v2970_v38, %v1051_v1  ;;  %v3014_v40 = vshrl.u32 %v1353_v56, 30 }
 0x256   :  { %v1530_v21 = vmul.f32 %v1529_v6, %v1527_v11  ;;  %v1054_v25 = vshrl.u32 %v1036_v35, %v1052_v15  ;;  %v1057_v5 = vadd.s32 127, %v1056_v8  ;;  %v1533_v41 = vsub.s32 4, %v2942_v55 }
 0x257   :  { %v1226_v57 = vmul.f32 -0.001358992, %v1225_v3  ;;  %v1233_v39 = vmul.f32 -0.00019511016, %v1225_v3  ;;  %v1355_v10 = vshll.u32 %v3014_v40, 30  ;;  %v1241_v7 = vadd.s32 3, %v1224_v53 }
 0x258   :  { %v1531_v26 = vxor.u32 2147483648, %v1530_v21  ;;  %v1055_v16 = vor.u32 %v1054_v25, %v1053_v62  ;;  %v1058_v50 = vshll.u32 %v1057_v5, 23  ;;  %v1534_v48 = vsel %vm1411_vm8, %v1533_v41, %v2942_v55 }
 0x259   :  { %v1227_v13 = vadd.f32 0.041655596, %v1226_v57  ;;  %v1234_v43 = vadd.f32 0.008332121, %v1233_v39  ;;  %v3023_v45 = vsub.s32 %v1352_v31, %v1355_v10  ;;  %v1536_v24 = vsel %vm3009_vm5, 0, %v1534_v48 }
 0x25a   :  { %v1532_v37 = vsel %vm1411_vm8, %v1531_v26, %v1530_v21  ;;  %v1059_v51 = vor.u32 4788187, %v1058_v50  ;;  %v1062_v23 = vcvt.s32.f32 %v1055_v16  ;;  %v1242_v32 = vand.u32 3, %v1241_v7  ;;  %v1715_v7 = vpop.eup %1714 }
 0x25b   :  { %v1228_v46 = vmul.f32 %v1227_v13, %v1225_v3  ;;  %v1235_v49 = vmul.f32 %v1234_v43, %v1225_v3  ;;  %v1535_v38 = vsel %vm3009_vm5, %v2467_v52, %v1532_v37  ;;  %vm1357_vm9 = vcmp.lt.s32.totalorder %v3023_v45, 0 }
 0x25c   :  { %v1537_v17 = vmul.f32 %v1535_v38, %v1535_v38  ;;  %v1060_v27 = vand.u32 2147483647, %v1059_v51  ;;  %v1358_v28 = vsub.s32 0, %v3023_v45  ;;  %vm944_vm15 = vcmp.lt.s32.totalorder %v2482_v9, 0 }
 0x25d   :  { %v1229_v2 = vadd.f32 -0.4999988, %v1228_v46  ;;  %v1236_v60 = vadd.f32 -0.16666654, %v1235_v49  ;;  %v1553_v35 = vadd.s32 3, %v1536_v24  ;;  %vm1244_vm2 = vcmp.eq.s32.totalorder %v1242_v32, 0 }
 0x25e   :  { %v1538_v63 = vmul.f32 -0.001358992, %v1537_v17  ;;  %v1545_v42 = vmul.f32 -0.00019511016, %v1537_v17  ;;  %v1063_v14 = vmul.f32 %v1062_v23, %v1060_v27  ;;  %v1359_v55 = vsel %vm1357_vm9, %v1358_v28, %v3023_v45 }
 0x25f   :  { %v1230_v36 = vmul.f32 %v1229_v2, %v1225_v3  ;;  %v1237_v33 = vmul.f32 %v1236_v60, %v1225_v3  ;;  %v1360_v1 = vclz %v1359_v55  ;;  %v3136_v15 = vand.u32 2147483647, %v2482_v9 }
 0x260   :  { %v1539_v34 = vadd.f32 0.041655596, %v1538_v63  ;;  %v1546_v4 = vadd.f32 0.008332121, %v1545_v42  ;;  %v1064_v6 = vxor.u32 2147483648, %v1063_v14  ;;  %v1554_v26 = vand.u32 3, %v1553_v35 }
 0x261   :  { %v1231_v0 = vadd.f32 1.0, %v1230_v36  ;;  %v1238_v44 = vadd.f32 1.0, %v1237_v33  ;;  %vm3037_vm1 = vcmp.le.f32.partialorder %v3136_v15, 0.7853982  ;;  %v1687_v21 = vadd.s32 4294967294, %v1360_v1 }
 0x262   :  { %v1540_v31 = vmul.f32 %v1539_v34, %v1537_v17  ;;  %v1547_v11 = vmul.f32 %v1546_v4, %v1537_v17  ;;  %v1065_v12 = vsel %vm944_vm15, %v1064_v6, %v1063_v14  ;;  %vm1243_vm10 = vcmp.lt.s32.totalorder %v1242_v32, 2 }
 0x263   :  { %v1239_v3 = vmul.f32 %v1238_v44, %v2999_v54  ;;  %v1248_v57 = vxor.u32 2147483648, %v1231_v0  ;;  %v3046_v54 = vsel %vm3037_vm1, %v2482_v9, %v1065_v12  ;;  %vm1688_vm3 = vcmp.lt.s32.totalorder %v1687_v21, 0 }
 0x264   :  { %v1541_v53 = vadd.f32 -0.4999988, %v1540_v31  ;;  %v1548_v59 = vadd.f32 -0.16666654, %v1547_v11  ;;  %v1070_v29 = vmul.f32 %v3046_v54, %v3046_v54  ;;  %v1363_v62 = vsel %vm1688_vm3, 0, %v1687_v21 }
 0x265   :  { %v1245_v56 = vxor.u32 2147483648, %v1239_v3  ;;  %vm1247_vm11 = vcmp.eq.s32.totalorder %v1242_v32, 2  ;;  %v1348_v22 = vadd.s32 %v2981_v47, %v2977_v61  ;;  %v1364_v37 = vsub.s32 32, %v1363_v62 }
 0x266   :  { %v1542_v39 = vmul.f32 %v1541_v53, %v1537_v17  ;;  %v1549_v18 = vmul.f32 %v1548_v59, %v1537_v17  ;;  %v1249_v43 = vsel %vm1247_vm11, %v1248_v57, %v1239_v3  ;;  %v1078_v41 = vmul.f32 -0.00019511016, %v1070_v29 }
 0x267   :  { %v1246_v25 = vsel %vm1244_vm2, %v1231_v0, %v1245_v56  ;;  %v1368_v46 = vsub.s32 4294967266, %v1363_v62  ;;  %vm1240_vm4 = vweird.f32 %v2464_v30  ;;  %vm1559_vm14 = vcmp.eq.s32.totalorder %v1554_v26, 2 }
 0x268   :  { %v1543_v5 = vadd.f32 1.0, %v1542_v39  ;;  %v1550_v13 = vadd.f32 1.0, %v1549_v18  ;;  %v1250_v16 = vsel %vm1243_vm10, %v1246_v25, %v1249_v43  ;;  %v1079_v19 = vadd.f32 0.008332121, %v1078_v41 }
 0x269   :  { %v1366_v49 = vshrl.u32 %v1348_v22, %v1364_v37  ;;  %v1071_v51 = vmul.f32 -0.001358992, %v1070_v29  ;;  %v1365_v2 = vshll.u32 %v3023_v45, %v1363_v62  ;;  %v1369_v60 = vadd.s32 127, %v1368_v46 }
 0x26a   :  { %v1551_v50 = vmul.f32 %v1550_v13, %v1535_v38  ;;  %v1560_v10 = vxor.u32 2147483648, %v1543_v5  ;;  %v1251_v48 = vsel %vm1240_vm4, nan, %v1250_v16  ;;  %vm1555_vm0 = vcmp.lt.s32.totalorder %v1554_v26, 2 }
 0x26b   :  { %vm1556_vm6 = vcmp.eq.s32.totalorder %v1554_v26, 0  ;;  %v1080_v63 = vmul.f32 %v1079_v19, %v1070_v29  ;;  %v1367_v38 = vor.u32 %v1366_v49, %v1365_v2  ;;  %v1370_v42 = vshll.u32 %v1369_v60, 23  ;;  %v3142_v60 = vld [vmem:[#allocation16_spill] sm:$0xff] }
 0x26c   :  { %v1557_v17 = vxor.u32 2147483648, %v1551_v50  ;;  %v1561_v61 = vsel %vm1559_vm14, %v1560_v10, %v1551_v50  ;;  %vm1552_vm7 = vweird.f32 %v2467_v52  ;;  %v1072_v23 = vadd.f32 0.041655596, %v1071_v51 }
 0x26d   :  { %v1371_v36 = vor.u32 4788187, %v1370_v42  ;;  %v1081_v28 = vadd.f32 -0.16666654, %v1080_v63  ;;  %v1374_v45 = vcvt.s32.f32 %v1367_v38  ;;  %v1066_v4 = vsub.s32 4, %v2961_v58 }
 0x26e   :  { %v1558_v47 = vsel %vm1556_vm6, %v1543_v5, %v1557_v17  ;;  %v1073_v14 = vmul.f32 %v1072_v23, %v1070_v29  ;;  %vm1256_vm8 = vcmp.lt.s32.totalorder %v2510_v20, 0  ;;  %v3139_v11 = vand.u32 2147483647, %v2510_v20  ;;  %v1709_v23 = vld [vmem:[%s3092_s6] ss:$0 sm:$0xff] }
 0x26f   :  { %v1562_v30 = vsel %vm1555_vm0, %v1558_v47, %v1561_v61  ;;  %v1372_v24 = vand.u32 2147483647, %v1371_v36  ;;  %v1082_v32 = vmul.f32 %v1081_v28, %v1070_v29  ;;  %v1067_v52 = vsel %vm944_vm15, %v1066_v4, %v2961_v58 }
 0x270   :  { %v1563_v27 = vsel %vm1552_vm7, nan, %v1562_v30  ;;  %v1074_v31 = vadd.f32 -0.4999988, %v1073_v14  ;;  %vm3063_vm12 = vcmp.le.f32.partialorder %v3139_v11, 0.7853982  ;;  %v1378_v3 = vsub.s32 4, %v3014_v40 }
 0x271   :  { %v1565_v33 = vadd.f32 %v1563_v27, %v1251_v48  ;;  %v1375_v0 = vmul.f32 %v1374_v45, %v1372_v24  ;;  %v1069_v15 = vsel %vm3037_vm1, 0, %v1067_v52  ;;  %v1083_v53 = vadd.f32 1.0, %v1082_v32 }
 0x272   :  { %v1075_v58 = vmul.f32 %v1074_v31, %v1070_v29  ;;  %v1086_v56 = vadd.s32 3, %v1069_v15  ;;  %v1379_v57 = vsel %vm1256_vm8, %v1378_v3, %v3014_v40  ;;  %1716 = vtanh.f32 %v3142_v60 }
 0x273   :  { %v1567_v34 = vmul.f32 0.05, %v1565_v33  ;;  %v1376_v55 = vxor.u32 2147483648, %v1375_v0  ;;  %v1084_v39 = vmul.f32 %v1083_v53, %v3046_v54  ;;  %v1381_v62 = vsel %vm3063_vm12, 0, %v1379_v57 }
 0x274   :  { %v1076_v26 = vadd.f32 1.0, %v1075_v58  ;;  %v1087_v8 = vand.u32 3, %v1086_v56  ;;  %v1398_v29 = vadd.s32 3, %v1381_v62  ;;  %vm1085_vm15 = vweird.f32 %v2482_v9 }
 0x275   :  { %v1569_v44 = vadd.f32 %v1715_v7, %v1567_v34  ;;  %v1377_v1 = vsel %vm1256_vm8, %v1376_v55, %v1375_v0  ;;  %v1090_v43 = vxor.u32 2147483648, %v1084_v39  ;;  %vm1397_vm10 = vweird.f32 %v2510_v20 }
 0x276   :  { %v1380_v35 = vsel %vm3063_vm12, %v2510_v20, %v1377_v1  ;;  %v1093_v37 = vxor.u32 2147483648, %v1076_v26  ;;  %vm1089_vm13 = vcmp.eq.s32.totalorder %v1087_v8, 0  ;;  %vm1092_vm5 = vcmp.eq.s32.totalorder %v1087_v8, 2 }
 0x277   :  { %1642 = vmatmul.f32.vlgmr.msrb.gmra.mxu3 %v1569_v44  ;;  %v1382_v59 = vmul.f32 %v1380_v35, %v1380_v35  ;;  %v1091_v40 = vsel %vm1089_vm13, %v1076_v26, %v1090_v43  ;;  %v1399_v46 = vand.u32 3, %v1398_v29  ;;  %vm1088_vm9 = vcmp.lt.s32.totalorder %v1087_v8, 2 }
 0x278   :  { %v1094_v19 = vsel %vm1092_vm5, %v1093_v37, %v1084_v39  ;;  %v1717_v42 = vpop.eup %1716 }
 0x279   :  { %v1383_v12 = vmul.f32 -0.001358992, %v1382_v59  ;;  %v1390_v21 = vmul.f32 -0.00019511016, %v1382_v59  ;;  %v1095_v51 = vsel %vm1088_vm9, %v1091_v40, %v1094_v19  ;;  %vm1401_vm1 = vcmp.eq.s32.totalorder %v1399_v46, 0 }
 0x27a   :  { %vm1404_vm2 = vcmp.eq.s32.totalorder %v1399_v46, 2  ;;  %v1096_v7 = vsel %vm1085_vm15, nan, %v1095_v51  ;;  %vm1400_vm3 = vcmp.lt.s32.totalorder %v1399_v46, 2 }
 0x27b   :  { %v1384_v18 = vadd.f32 0.041655596, %v1383_v12  ;;  %v1391_v25 = vadd.f32 0.008332121, %v1390_v21 }
 0x27d   :  { %v1385_v5 = vmul.f32 %v1384_v18, %v1382_v59  ;;  %v1392_v13 = vmul.f32 %v1391_v25, %v1382_v59 }
 0x27f   :  { %v1386_v41 = vadd.f32 -0.4999988, %v1385_v5  ;;  %v1393_v22 = vadd.f32 -0.16666654, %v1392_v13 }
 0x281   :  { %v1387_v16 = vmul.f32 %v1386_v41, %v1382_v59  ;;  %v1394_v50 = vmul.f32 %v1393_v22, %v1382_v59 }
 0x283   :  { %v1388_v10 = vadd.f32 1.0, %v1387_v16  ;;  %v1395_v54 = vadd.f32 1.0, %v1394_v50 }
 0x285   :  { %v1396_v49 = vmul.f32 %v1395_v54, %v1380_v35  ;;  %v1405_v17 = vxor.u32 2147483648, %v1388_v10 }
 0x287   :  { %v1402_v2 = vxor.u32 2147483648, %v1396_v49  ;;  %v1406_v61 = vsel %vm1404_vm2, %v1405_v17, %v1396_v49 }
 0x289   :  { %v1403_v48 = vsel %vm1401_vm1, %v1388_v10, %v1402_v2 }
 0x28a   :  { %v1407_v47 = vsel %vm1400_vm3, %v1403_v48, %v1406_v61 }
 0x28b   :  { %v1408_v63 = vsel %vm1397_vm10, nan, %v1407_v47 }
 0x28c   :  { %v1564_v38 = vadd.f32 %v1408_v63, %v1096_v7 }
 0x28e   :  { %v1566_v30 = vmul.f32 0.05, %v1564_v38 }
 0x290   :  { %v1568_v27 = vadd.f32 %v1717_v42, %v1566_v30 }
 0x292   :  { %1622 = vmatmul.f32.vlgmr.msrb.gmra.mxu2 %v1568_v27 }
 0x2fa   :  { %v1643_v20 = vpop.f32.mrf.mxu3 }
 0x315   :  { %v1623_v9 = vpop.f32.mrf.mxu2 }
 0x316   :  { %v1624_v36 = vadd.f32 %v1709_v23, %v1623_v9 }
 0x318   :  { %v1644_v33 = vadd.f32 %v1643_v20, %v1624_v36 }
 0x31a   :  { %1646 = vst [vmem:[#allocation11] sm:$0xff] %v1644_v33 }
 0x31b   :  { %1657 = dma.vmem_to_hbm [thread:$0]  %s1653_s29, 128, %s1655_s9, [#allocation4]  }
 0x31c   :  { %1868 = dma.done.wait [#allocation4], 128  }
 0x31d   :  { %1869 = vsyncadd [#allocation4], 4294967168 }
 0x31e   :  { %1662 = vsyncpa [#allocation3], 1 }
 0x31f   :  { %1663 = vsyncpa [#allocation6], 1 }
 0x320   :  { %1664 = vsyncpa [#allocation9], 1 }
 0x321   :  { %1665 = vsyncpa [#allocation4], 1 }

</bundles_post_ra>
